<compile_context>
chip_gen: v6e
topology: v6e:2x2x1
jax: 0.10.0
libtpu: 0.0.40
codegen_flags: <defaults>
</compile_context>

<pallas_src>
import math

import jax
import jax.numpy as jnp
from jax.experimental import pallas as pl
from jax.experimental.pallas import tpu as pltpu

# ---------------- configuration (small, consistent with the module) ----------
B = 2                      # batch
C_IN = 3                   # image channels
IMG = 16                   # image H = W
PATCH = 8                  # patch size
GRID_HW = IMG // PATCH
N_PATCH = GRID_HW * GRID_HW            # 4 patches
K_PATCH = C_IN * PATCH * PATCH         # 192 (flattened patch length)
D = 32                     # embed dim
NUM_HEADS = 2
HEAD_DIM = D // NUM_HEADS
MLP_HIDDEN = 4 * D         # 128
NUM_BLOCKS = 2
NUM_PRED = 2               # divides NUM_BLOCKS -> mini_trans = 1
MINI_TRANS = NUM_BLOCKS // NUM_PRED
NUM_CLASSES = 10
HEAD_PAD = 128             # lane-dense head output (sliced back to NUM_CLASSES)
SEQ = N_PATCH + 1          # +1 cls token
BS = B * SEQ               # total tokens processed in one tile
LN_EPS = 1e-6
NEG_INF = -1e30            # additive mask for cross-image attention scores


# ---------------- in-kernel helpers ------------------------------------------
def _layernorm(x, g, b):
    mu = jnp.mean(x, axis=-1, keepdims=True)
    xc = x - mu
    var = jnp.mean(xc * xc, axis=-1, keepdims=True)
    return xc * jax.lax.rsqrt(var + LN_EPS) * g + b


def _gelu(x):
    # TODO(synk): PyTorch nn.GELU defaults to exact erf-GELU; tanh approximation used here.
    return 0.5 * x * (1.0 + jnp.tanh(0.7978845608028654 * (x + 0.044715 * x * x * x)))


# ---------------- single fused forward kernel --------------------------------
def _fused_vit_kernel(
    tok_ref, attn_bias_ref, cls_sel_ref,
    embed_w_ref, embed_add_ref,
    ln1g_ref, ln1b_ref, wqkv_ref, bqkv_ref, wproj_ref, bproj_ref,
    ln2g_ref, ln2b_ref, wfc1_ref, bfc1_ref, wfc2_ref, bfc2_ref,
    ng_ref, nb_ref, fg_ref, fb_ref, whead_ref, bhead_ref,
    o_ref,
):
    f32 = jnp.float32

    # patch_embed conv + cls token + conv bias + pos_embed, all via one matmul + add.
    # tok_ref carries a trailing indicator column so the extended embedding matrix
    # emits the cls token for row 0 of every image and the patch projection otherwise.
    x = jnp.dot(tok_ref[...], embed_w_ref[...],
                preferred_element_type=f32) + embed_add_ref[...]          # [BS, D]

    attn_bias = attn_bias_ref[...]                                        # [BS, BS]
    scale = 1.0 / math.sqrt(HEAD_DIM)

    for blk in range(NUM_BLOCKS):                     # static unroll, weights in VMEM
        # --- attention branch: x + proj(MHSA(LN1(x))) ---
        h = _layernorm(x, ln1g_ref[blk], ln1b_ref[blk])
        qkv = jnp.dot(h, wqkv_ref[blk],
                      preferred_element_type=f32) + bqkv_ref[blk]         # [BS, 3D]
        wproj = wproj_ref[blk]                                            # [D, D]
        attn_out = None
        for hd in range(NUM_HEADS):
            lo = hd * HEAD_DIM
            q = qkv[:, lo:lo + HEAD_DIM]
            k = qkv[:, D + lo:D + lo + HEAD_DIM]
            v = qkv[:, 2 * D + lo:2 * D + lo + HEAD_DIM]
            # scores over all B*SEQ tokens; cross-image entries masked to -inf-like
            s = jax.lax.dot_general(q, k, (((1,), (1,)), ((), ())),
                                    preferred_element_type=f32) * scale + attn_bias
            s = s - jnp.max(s, axis=-1, keepdims=True)
            p = jnp.exp(s)
            p = p / jnp.sum(p, axis=-1, keepdims=True)
            ctx = jnp.dot(p, v, preferred_element_type=f32)               # [BS, HEAD_DIM]
            # fold the head-concat into the projection: ctx_h @ wproj[rows of head h]
            part = jnp.dot(ctx, wproj[lo:lo + HEAD_DIM, :],
                           preferred_element_type=f32)                    # [BS, D]
            attn_out = part if attn_out is None else attn_out + part
        x = x + attn_out + bproj_ref[blk]

        # --- MLP branch: x + fc2(gelu(fc1(LN2(x)))) ---
        h2 = _layernorm(x, ln2g_ref[blk], ln2b_ref[blk])
        m = jnp.dot(h2, wfc1_ref[blk], preferred_element_type=f32) + bfc1_ref[blk]
        m = _gelu(m)
        m = jnp.dot(m, wfc2_ref[blk], preferred_element_type=f32) + bfc2_ref[blk]
        x = x + m

    # --- prediction head (only the final one is returned by the module) ---
    # Select the CLS row of every image via a tiny selector matmul (no strided slice).
    cls = jnp.dot(cls_sel_ref[...], x, preferred_element_type=f32)        # [B, D]
    cls = _layernorm(cls, ng_ref[...], nb_ref[...])                       # model.norm
    cls = _layernorm(cls, fg_ref[...], fb_ref[...])                       # model.fc_norm
    out = jnp.dot(cls, whead_ref[...], preferred_element_type=f32) + bhead_ref[...]
    o_ref[...] = out.astype(o_ref.dtype)                                  # [B, 128] lane-dense


# ---------------- parameters (deterministic, synthetic) -----------------------
def init_params(key):
    ks = jax.random.split(key, 8 + NUM_BLOCKS)

    def w(k, shape):
        return 0.02 * jax.random.normal(k, shape, dtype=jnp.float32)

    params = {
        # patch_embed: Conv2d(C_IN, D, kernel=PATCH, stride=PATCH) flattened to a matmul
        "patch_w": w(ks[0], (K_PATCH, D)),
        "patch_b": jnp.zeros((D,), jnp.float32),
        "cls_token": w(ks[1], (1, 1, D)),
        "pos_embed": w(ks[2], (1, SEQ, D)),
        "norm_g": jnp.ones((D,), jnp.float32),
        "norm_b": jnp.zeros((D,), jnp.float32),
        "fc_norm_g": jnp.ones((D,), jnp.float32),
        "fc_norm_b": jnp.zeros((D,), jnp.float32),
        "head_w": w(ks[3], (D, NUM_CLASSES)),
        "head_b": jnp.zeros((NUM_CLASSES,), jnp.float32),
        "blocks": [],
    }
    for i in range(NUM_BLOCKS):
        bk = jax.random.split(ks[4 + i], 4)
        params["blocks"].append({
            "ln1_g": jnp.ones((D,), jnp.float32),
            "ln1_b": jnp.zeros((D,), jnp.float32),
            "wqkv": w(bk[0], (D, 3 * D)),
            "bqkv": jnp.zeros((3 * D,), jnp.float32),
            "wproj": w(bk[1], (D, D)),
            "bproj": jnp.zeros((D,), jnp.float32),
            "ln2_g": jnp.ones((D,), jnp.float32),
            "ln2_b": jnp.zeros((D,), jnp.float32),
            "wfc1": w(bk[2], (D, MLP_HIDDEN)),
            "bfc1": jnp.zeros((MLP_HIDDEN,), jnp.float32),
            "wfc2": w(bk[3], (MLP_HIDDEN, D)),
            "bfc2": jnp.zeros((D,), jnp.float32),
        })
    return params


def pack_params(params):
    """One-time repack of the natural (PyTorch-style) params into fused-kernel layout."""
    blocks = params["blocks"]

    def stack(name, shape):
        return jnp.stack([b[name].reshape(shape) for b in blocks])

    # Extended embedding matrix: rows = [patch_w ; cls_token].  Input tokens carry a
    # trailing indicator column (1 for cls rows, 0 for patch rows).
    embed_w = jnp.concatenate(
        [params["patch_w"], params["cls_token"].reshape(1, D)], axis=0)      # [K+1, D]
    # Additive term: pos_embed for every row, plus the conv bias for patch rows only.
    row_bias = jnp.concatenate(
        [jnp.zeros((1, D), jnp.float32),
         jnp.tile(params["patch_b"].reshape(1, D), (N_PATCH, 1))], axis=0)   # [SEQ, D]
    embed_add = jnp.tile(params["pos_embed"].reshape(SEQ, D) + row_bias, (B, 1))  # [BS, D]

    # Block-diagonal (per-image) attention mask and CLS-row selector.
    tok_batch = jnp.repeat(jnp.arange(B), SEQ)
    attn_bias = jnp.where(tok_batch[:, None] == tok_batch[None, :],
                          0.0, NEG_INF).astype(jnp.float32)                  # [BS, BS]
    cls_sel = jnp.zeros((B, BS), jnp.float32).at[
        jnp.arange(B), jnp.arange(B) * SEQ].set(1.0)                         # [B, BS]

    # Lane-dense head (pad classes to 128; zero-padded columns sliced off outside).
    head_w = jnp.zeros((D, HEAD_PAD), jnp.float32).at[:, :NUM_CLASSES].set(params["head_w"])
    head_b = jnp.zeros((1, HEAD_PAD), jnp.float32).at[0, :NUM_CLASSES].set(params["head_b"])

    return {
        "embed_w": embed_w, "embed_add": embed_add,
        "attn_bias": attn_bias, "cls_sel": cls_sel,
        "ln1_g": stack("ln1_g", (1, D)), "ln1_b": stack("ln1_b", (1, D)),
        "wqkv": stack("wqkv", (D, 3 * D)), "bqkv": stack("bqkv", (1, 3 * D)),
        "wproj": stack("wproj", (D, D)), "bproj": stack("bproj", (1, D)),
        "ln2_g": stack("ln2_g", (1, D)), "ln2_b": stack("ln2_b", (1, D)),
        "wfc1": stack("wfc1", (D, MLP_HIDDEN)), "bfc1": stack("bfc1", (1, MLP_HIDDEN)),
        "wfc2": stack("wfc2", (MLP_HIDDEN, D)), "bfc2": stack("bfc2", (1, D)),
        "norm_g": params["norm_g"].reshape(1, D), "norm_b": params["norm_b"].reshape(1, D),
        "fc_norm_g": params["fc_norm_g"].reshape(1, D),
        "fc_norm_b": params["fc_norm_b"].reshape(1, D),
        "head_w": head_w, "head_b": head_b,
    }


# ---------------- forward (mirrors Big_model.forward) --------------------------
def forward(x_img, pp):
    B_, C_, H_, W_ = x_img.shape
    gh, gw = H_ // PATCH, W_ // PATCH

    # patchify (pure layout plumbing; stride-PATCH conv == patchify + matmul)
    patches = x_img.reshape(B_, C_, gh, PATCH, gw, PATCH)
    patches = patches.transpose(0, 2, 4, 1, 3, 5).reshape(B_, gh * gw, K_PATCH)
    # indicator column: 0 for patch rows, 1 for the per-image cls row
    patch_rows = jnp.concatenate(
        [patches, jnp.zeros((B_, gh * gw, 1), patches.dtype)], axis=-1)
    cls_rows = jnp.concatenate(
        [jnp.zeros((B_, 1, K_PATCH), patches.dtype),
         jnp.ones((B_, 1, 1), patches.dtype)], axis=-1)
    tok_in = jnp.concatenate([cls_rows, patch_rows], axis=1).reshape(B_ * SEQ, K_PATCH + 1)

    n_inputs = 23
    vmem = pl.BlockSpec(memory_space=pltpu.MemorySpace.VMEM)
    out_pad = pl.pallas_call(
        _fused_vit_kernel,
        out_shape=jax.ShapeDtypeStruct((B_, HEAD_PAD), jnp.float32),
        in_specs=[vmem] * n_inputs,
        out_specs=vmem,
    )(
        tok_in, pp["attn_bias"], pp["cls_sel"],
        pp["embed_w"], pp["embed_add"],
        pp["ln1_g"], pp["ln1_b"], pp["wqkv"], pp["bqkv"], pp["wproj"], pp["bproj"],
        pp["ln2_g"], pp["ln2_b"], pp["wfc1"], pp["bfc1"], pp["wfc2"], pp["bfc2"],
        pp["norm_g"], pp["norm_b"], pp["fc_norm_g"], pp["fc_norm_b"],
        pp["head_w"], pp["head_b"],
    )
    return out_pad[:, :NUM_CLASSES]


if __name__ == "__main__":
    key = jax.random.PRNGKey(0)
    pkey, xkey = jax.random.split(key)
    params = init_params(pkey)
    packed = pack_params(params)          # one-time weight repack (stacked / padded)
    x = jax.random.normal(xkey, (B, C_IN, IMG, IMG), dtype=jnp.float32)

    fwd = jax.jit(forward)
    out = jax.block_until_ready(fwd(x, packed))

    assert out.shape == (B, NUM_CLASSES), out.shape
    assert bool(jnp.all(jnp.isfinite(out)))
    print("KERNEL_OK")
</pallas_src>

<mosaic_0001>
module attributes {stable_mosaic.version = 11 : i64} {
  func.func @_fused_vit_kernel(%arg0: memref<10x193xf32, #tpu.memory_space<vmem>>, %arg1: memref<10x10xf32, #tpu.memory_space<vmem>>, %arg2: memref<2x10xf32, #tpu.memory_space<vmem>>, %arg3: memref<193x32xf32, #tpu.memory_space<vmem>>, %arg4: memref<10x32xf32, #tpu.memory_space<vmem>>, %arg5: memref<2x1x32xf32, #tpu.memory_space<vmem>>, %arg6: memref<2x1x32xf32, #tpu.memory_space<vmem>>, %arg7: memref<2x32x96xf32, #tpu.memory_space<vmem>>, %arg8: memref<2x1x96xf32, #tpu.memory_space<vmem>>, %arg9: memref<2x32x32xf32, #tpu.memory_space<vmem>>, %arg10: memref<2x1x32xf32, #tpu.memory_space<vmem>>, %arg11: memref<2x1x32xf32, #tpu.memory_space<vmem>>, %arg12: memref<2x1x32xf32, #tpu.memory_space<vmem>>, %arg13: memref<2x32x128xf32, #tpu.memory_space<vmem>>, %arg14: memref<2x1x128xf32, #tpu.memory_space<vmem>>, %arg15: memref<2x128x32xf32, #tpu.memory_space<vmem>>, %arg16: memref<2x1x32xf32, #tpu.memory_space<vmem>>, %arg17: memref<1x32xf32, #tpu.memory_space<vmem>>, %arg18: memref<1x32xf32, #tpu.memory_space<vmem>>, %arg19: memref<1x32xf32, #tpu.memory_space<vmem>>, %arg20: memref<1x32xf32, #tpu.memory_space<vmem>>, %arg21: memref<32x128xf32, #tpu.memory_space<vmem>>, %arg22: memref<1x128xf32, #tpu.memory_space<vmem>>, %arg23: memref<2x128xf32, #tpu.memory_space<vmem>>) attributes {dimension_semantics = [], scalar_prefetch = 0 : i64, scratch_operands = 0 : i64, tpu.core_type = #tpu.core_type<tc>} {
    %c0 = arith.constant 0 : index
    %c0_0 = arith.constant 0 : index
    %0 = vector.load %arg0[%c0, %c0_0] : memref<10x193xf32, #tpu.memory_space<vmem>>, vector<10x193xf32>
    %c0_1 = arith.constant 0 : index
    %c0_2 = arith.constant 0 : index
    %1 = vector.load %arg3[%c0_1, %c0_2] : memref<193x32xf32, #tpu.memory_space<vmem>>, vector<193x32xf32>
    %cst = arith.constant dense<0.000000e+00> : vector<10x32xf32>
    %2 = tpu.matmul %0, %1, %cst {dimension_numbers = #tpu.dot_dimension_numbers<[1], [0], [0], [1], [0, 0, 1, 1], [], []>} : vector<10x193xf32>, vector<193x32xf32>, vector<10x32xf32> -> vector<10x32xf32>
    %c0_3 = arith.constant 0 : index
    %c0_4 = arith.constant 0 : index
    %3 = vector.load %arg4[%c0_3, %c0_4] : memref<10x32xf32, #tpu.memory_space<vmem>>, vector<10x32xf32>
    %4 = arith.addf %2, %3 : vector<10x32xf32>
    %c0_5 = arith.constant 0 : index
    %c0_6 = arith.constant 0 : index
    %5 = vector.load %arg1[%c0_5, %c0_6] : memref<10x10xf32, #tpu.memory_space<vmem>>, vector<10x10xf32>
    %c0_7 = arith.constant 0 : index
    %c0_8 = arith.constant 0 : index
    %c0_9 = arith.constant 0 : index
    %6 = vector.load %arg5[%c0_7, %c0_8, %c0_9] : memref<2x1x32xf32, #tpu.memory_space<vmem>>, vector<1x1x32xf32>
    %7 = vector.shape_cast %6 : vector<1x1x32xf32> to vector<1x32xf32>
    %c0_10 = arith.constant 0 : index
    %c0_11 = arith.constant 0 : index
    %c0_12 = arith.constant 0 : index
    %8 = vector.load %arg6[%c0_10, %c0_11, %c0_12] : memref<2x1x32xf32, #tpu.memory_space<vmem>>, vector<1x1x32xf32>
    %9 = vector.shape_cast %8 : vector<1x1x32xf32> to vector<1x32xf32>
    %cst_13 = arith.constant dense<0.000000e+00> : vector<10xf32>
    %10 = vector.multi_reduction <add>, %4, %cst_13 [1] : vector<10x32xf32> to vector<10xf32>
    %11 = vector.shape_cast %10 : vector<10xf32> to vector<10x1xf32>
    %cst_14 = arith.constant 3.200000e+01 : f32
    %12 = vector.broadcast %cst_14 : f32 to vector<10x1xf32>
    %13 = arith.divf %11, %12 : vector<10x1xf32>
    %14 = vector.broadcast %13 : vector<10x1xf32> to vector<10x32xf32>
    %15 = arith.subf %4, %14 : vector<10x32xf32>
    %16 = arith.mulf %15, %15 : vector<10x32xf32>
    %cst_15 = arith.constant dense<0.000000e+00> : vector<10xf32>
    %17 = vector.multi_reduction <add>, %16, %cst_15 [1] : vector<10x32xf32> to vector<10xf32>
    %18 = vector.shape_cast %17 : vector<10xf32> to vector<10x1xf32>
    %cst_16 = arith.constant 3.200000e+01 : f32
    %19 = vector.broadcast %cst_16 : f32 to vector<10x1xf32>
    %20 = arith.divf %18, %19 : vector<10x1xf32>
    %cst_17 = arith.constant 9.99999997E-7 : f32
    %21 = vector.broadcast %cst_17 : f32 to vector<10x1xf32>
    %22 = arith.addf %20, %21 : vector<10x1xf32>
    %23 = math.rsqrt %22 : vector<10x1xf32>
    %24 = vector.broadcast %23 : vector<10x1xf32> to vector<10x32xf32>
    %25 = arith.mulf %15, %24 : vector<10x32xf32>
    %26 = vector.broadcast %7 : vector<1x32xf32> to vector<10x32xf32>
    %27 = arith.mulf %25, %26 : vector<10x32xf32>
    %28 = vector.broadcast %9 : vector<1x32xf32> to vector<10x32xf32>
    %29 = arith.addf %27, %28 : vector<10x32xf32>
    %c0_18 = arith.constant 0 : index
    %c0_19 = arith.constant 0 : index
    %c0_20 = arith.constant 0 : index
    %30 = vector.load %arg7[%c0_18, %c0_19, %c0_20] : memref<2x32x96xf32, #tpu.memory_space<vmem>>, vector<1x32x96xf32>
    %31 = vector.shape_cast %30 : vector<1x32x96xf32> to vector<32x96xf32>
    %cst_21 = arith.constant dense<0.000000e+00> : vector<10x96xf32>
    %32 = tpu.matmul %29, %31, %cst_21 {dimension_numbers = #tpu.dot_dimension_numbers<[1], [0], [0], [1], [0, 0, 1, 1], [], []>} : vector<10x32xf32>, vector<32x96xf32>, vector<10x96xf32> -> vector<10x96xf32>
    %c0_22 = arith.constant 0 : index
    %c0_23 = arith.constant 0 : index
    %c0_24 = arith.constant 0 : index
    %33 = vector.load %arg8[%c0_22, %c0_23, %c0_24] : memref<2x1x96xf32, #tpu.memory_space<vmem>>, vector<1x1x96xf32>
    %34 = vector.shape_cast %33 : vector<1x1x96xf32> to vector<1x96xf32>
    %35 = vector.broadcast %34 : vector<1x96xf32> to vector<10x96xf32>
    %36 = arith.addf %32, %35 : vector<10x96xf32>
    %c0_25 = arith.constant 0 : index
    %c0_26 = arith.constant 0 : index
    %c0_27 = arith.constant 0 : index
    %37 = vector.load %arg9[%c0_25, %c0_26, %c0_27] : memref<2x32x32xf32, #tpu.memory_space<vmem>>, vector<1x32x32xf32>
    %38 = vector.shape_cast %37 : vector<1x32x32xf32> to vector<32x32xf32>
    %39 = vector.extract_strided_slice %36 {offsets = [0, 0], sizes = [10, 16], strides = [1, 1]} : vector<10x96xf32> to vector<10x16xf32>
    %40 = vector.extract_strided_slice %36 {offsets = [0, 32], sizes = [10, 16], strides = [1, 1]} : vector<10x96xf32> to vector<10x16xf32>
    %41 = vector.extract_strided_slice %36 {offsets = [0, 64], sizes = [10, 16], strides = [1, 1]} : vector<10x96xf32> to vector<10x16xf32>
    %cst_28 = arith.constant dense<0.000000e+00> : vector<10x10xf32>
    %42 = tpu.matmul %39, %40, %cst_28 {dimension_numbers = #tpu.dot_dimension_numbers<[1], [1], [0], [0], [0, 0, 1, 0], [], []>} : vector<10x16xf32>, vector<10x16xf32>, vector<10x10xf32> -> vector<10x10xf32>
    %cst_29 = arith.constant 2.500000e-01 : f32
    %43 = vector.broadcast %cst_29 : f32 to vector<10x10xf32>
    %44 = arith.mulf %42, %43 : vector<10x10xf32>
    %45 = arith.addf %44, %5 : vector<10x10xf32>
    %cst_30 = arith.constant dense<0xFF800000> : vector<10xf32>
    %46 = vector.multi_reduction <maximumf>, %45, %cst_30 [1] : vector<10x10xf32> to vector<10xf32>
    %47 = vector.shape_cast %46 : vector<10xf32> to vector<10x1xf32>
    %48 = vector.broadcast %47 : vector<10x1xf32> to vector<10x10xf32>
    %49 = arith.subf %45, %48 : vector<10x10xf32>
    %50 = math.exp %49 : vector<10x10xf32>
    %cst_31 = arith.constant dense<0.000000e+00> : vector<10xf32>
    %51 = vector.multi_reduction <add>, %50, %cst_31 [1] : vector<10x10xf32> to vector<10xf32>
    %52 = vector.shape_cast %51 : vector<10xf32> to vector<10x1xf32>
    %53 = vector.broadcast %52 : vector<10x1xf32> to vector<10x10xf32>
    %54 = arith.divf %50, %53 : vector<10x10xf32>
    %cst_32 = arith.constant dense<0.000000e+00> : vector<10x16xf32>
    %55 = tpu.matmul %54, %41, %cst_32 {dimension_numbers = #tpu.dot_dimension_numbers<[1], [0], [0], [1], [0, 0, 1, 1], [], []>} : vector<10x10xf32>, vector<10x16xf32>, vector<10x16xf32> -> vector<10x16xf32>
    %56 = vector.extract_strided_slice %38 {offsets = [0, 0], sizes = [16, 32], strides = [1, 1]} : vector<32x32xf32> to vector<16x32xf32>
    %cst_33 = arith.constant dense<0.000000e+00> : vector<10x32xf32>
    %57 = tpu.matmul %55, %56, %cst_33 {dimension_numbers = #tpu.dot_dimension_numbers<[1], [0], [0], [1], [0, 0, 1, 1], [], []>} : vector<10x16xf32>, vector<16x32xf32>, vector<10x32xf32> -> vector<10x32xf32>
    %58 = vector.extract_strided_slice %36 {offsets = [0, 16], sizes = [10, 16], strides = [1, 1]} : vector<10x96xf32> to vector<10x16xf32>
    %59 = vector.extract_strided_slice %36 {offsets = [0, 48], sizes = [10, 16], strides = [1, 1]} : vector<10x96xf32> to vector<10x16xf32>
    %60 = vector.extract_strided_slice %36 {offsets = [0, 80], sizes = [10, 16], strides = [1, 1]} : vector<10x96xf32> to vector<10x16xf32>
    %cst_34 = arith.constant dense<0.000000e+00> : vector<10x10xf32>
    %61 = tpu.matmul %58, %59, %cst_34 {dimension_numbers = #tpu.dot_dimension_numbers<[1], [1], [0], [0], [0, 0, 1, 0], [], []>} : vector<10x16xf32>, vector<10x16xf32>, vector<10x10xf32> -> vector<10x10xf32>
    %cst_35 = arith.constant 2.500000e-01 : f32
    %62 = vector.broadcast %cst_35 : f32 to vector<10x10xf32>
    %63 = arith.mulf %61, %62 : vector<10x10xf32>
    %64 = arith.addf %63, %5 : vector<10x10xf32>
    %cst_36 = arith.constant dense<0xFF800000> : vector<10xf32>
    %65 = vector.multi_reduction <maximumf>, %64, %cst_36 [1] : vector<10x10xf32> to vector<10xf32>
    %66 = vector.shape_cast %65 : vector<10xf32> to vector<10x1xf32>
    %67 = vector.broadcast %66 : vector<10x1xf32> to vector<10x10xf32>
    %68 = arith.subf %64, %67 : vector<10x10xf32>
    %69 = math.exp %68 : vector<10x10xf32>
    %cst_37 = arith.constant dense<0.000000e+00> : vector<10xf32>
    %70 = vector.multi_reduction <add>, %69, %cst_37 [1] : vector<10x10xf32> to vector<10xf32>
    %71 = vector.shape_cast %70 : vector<10xf32> to vector<10x1xf32>
    %72 = vector.broadcast %71 : vector<10x1xf32> to vector<10x10xf32>
    %73 = arith.divf %69, %72 : vector<10x10xf32>
    %cst_38 = arith.constant dense<0.000000e+00> : vector<10x16xf32>
    %74 = tpu.matmul %73, %60, %cst_38 {dimension_numbers = #tpu.dot_dimension_numbers<[1], [0], [0], [1], [0, 0, 1, 1], [], []>} : vector<10x10xf32>, vector<10x16xf32>, vector<10x16xf32> -> vector<10x16xf32>
    %75 = vector.extract_strided_slice %38 {offsets = [16, 0], sizes = [16, 32], strides = [1, 1]} : vector<32x32xf32> to vector<16x32xf32>
    %cst_39 = arith.constant dense<0.000000e+00> : vector<10x32xf32>
    %76 = tpu.matmul %74, %75, %cst_39 {dimension_numbers = #tpu.dot_dimension_numbers<[1], [0], [0], [1], [0, 0, 1, 1], [], []>} : vector<10x16xf32>, vector<16x32xf32>, vector<10x32xf32> -> vector<10x32xf32>
    %77 = arith.addf %57, %76 : vector<10x32xf32>
    %78 = arith.addf %4, %77 : vector<10x32xf32>
    %c0_40 = arith.constant 0 : index
    %c0_41 = arith.constant 0 : index
    %c0_42 = arith.constant 0 : index
    %79 = vector.load %arg10[%c0_40, %c0_41, %c0_42] : memref<2x1x32xf32, #tpu.memory_space<vmem>>, vector<1x1x32xf32>
    %80 = vector.shape_cast %79 : vector<1x1x32xf32> to vector<1x32xf32>
    %81 = vector.broadcast %80 : vector<1x32xf32> to vector<10x32xf32>
    %82 = arith.addf %78, %81 : vector<10x32xf32>
    %c0_43 = arith.constant 0 : index
    %c0_44 = arith.constant 0 : index
    %c0_45 = arith.constant 0 : index
    %83 = vector.load %arg11[%c0_43, %c0_44, %c0_45] : memref<2x1x32xf32, #tpu.memory_space<vmem>>, vector<1x1x32xf32>
    %84 = vector.shape_cast %83 : vector<1x1x32xf32> to vector<1x32xf32>
    %c0_46 = arith.constant 0 : index
    %c0_47 = arith.constant 0 : index
    %c0_48 = arith.constant 0 : index
    %85 = vector.load %arg12[%c0_46, %c0_47, %c0_48] : memref<2x1x32xf32, #tpu.memory_space<vmem>>, vector<1x1x32xf32>
    %86 = vector.shape_cast %85 : vector<1x1x32xf32> to vector<1x32xf32>
    %cst_49 = arith.constant dense<0.000000e+00> : vector<10xf32>
    %87 = vector.multi_reduction <add>, %82, %cst_49 [1] : vector<10x32xf32> to vector<10xf32>
    %88 = vector.shape_cast %87 : vector<10xf32> to vector<10x1xf32>
    %cst_50 = arith.constant 3.200000e+01 : f32
    %89 = vector.broadcast %cst_50 : f32 to vector<10x1xf32>
    %90 = arith.divf %88, %89 : vector<10x1xf32>
    %91 = vector.broadcast %90 : vector<10x1xf32> to vector<10x32xf32>
    %92 = arith.subf %82, %91 : vector<10x32xf32>
    %93 = arith.mulf %92, %92 : vector<10x32xf32>
    %cst_51 = arith.constant dense<0.000000e+00> : vector<10xf32>
    %94 = vector.multi_reduction <add>, %93, %cst_51 [1] : vector<10x32xf32> to vector<10xf32>
    %95 = vector.shape_cast %94 : vector<10xf32> to vector<10x1xf32>
    %cst_52 = arith.constant 3.200000e+01 : f32
    %96 = vector.broadcast %cst_52 : f32 to vector<10x1xf32>
    %97 = arith.divf %95, %96 : vector<10x1xf32>
    %cst_53 = arith.constant 9.99999997E-7 : f32
    %98 = vector.broadcast %cst_53 : f32 to vector<10x1xf32>
    %99 = arith.addf %97, %98 : vector<10x1xf32>
    %100 = math.rsqrt %99 : vector<10x1xf32>
    %101 = vector.broadcast %100 : vector<10x1xf32> to vector<10x32xf32>
    %102 = arith.mulf %92, %101 : vector<10x32xf32>
    %103 = vector.broadcast %84 : vector<1x32xf32> to vector<10x32xf32>
    %104 = arith.mulf %102, %103 : vector<10x32xf32>
    %105 = vector.broadcast %86 : vector<1x32xf32> to vector<10x32xf32>
    %106 = arith.addf %104, %105 : vector<10x32xf32>
    %c0_54 = arith.constant 0 : index
    %c0_55 = arith.constant 0 : index
    %c0_56 = arith.constant 0 : index
    %107 = vector.load %arg13[%c0_54, %c0_55, %c0_56] : memref<2x32x128xf32, #tpu.memory_space<vmem>>, vector<1x32x128xf32>
    %108 = vector.shape_cast %107 : vector<1x32x128xf32> to vector<32x128xf32>
    %cst_57 = arith.constant dense<0.000000e+00> : vector<10x128xf32>
    %109 = tpu.matmul %106, %108, %cst_57 {dimension_numbers = #tpu.dot_dimension_numbers<[1], [0], [0], [1], [0, 0, 1, 1], [], []>} : vector<10x32xf32>, vector<32x128xf32>, vector<10x128xf32> -> vector<10x128xf32>
    %c0_58 = arith.constant 0 : index
    %c0_59 = arith.constant 0 : index
    %c0_60 = arith.constant 0 : index
    %110 = vector.load %arg14[%c0_58, %c0_59, %c0_60] : memref<2x1x128xf32, #tpu.memory_space<vmem>>, vector<1x1x128xf32>
    %111 = vector.shape_cast %110 : vector<1x1x128xf32> to vector<1x128xf32>
    %112 = vector.broadcast %111 : vector<1x128xf32> to vector<10x128xf32>
    %113 = arith.addf %109, %112 : vector<10x128xf32>
    %cst_61 = arith.constant 5.000000e-01 : f32
    %114 = vector.broadcast %cst_61 : f32 to vector<10x128xf32>
    %115 = arith.mulf %114, %113 : vector<10x128xf32>
    %cst_62 = arith.constant 4.471500e-02 : f32
    %116 = vector.broadcast %cst_62 : f32 to vector<10x128xf32>
    %117 = arith.mulf %116, %113 : vector<10x128xf32>
    %118 = arith.mulf %117, %113 : vector<10x128xf32>
    %119 = arith.mulf %118, %113 : vector<10x128xf32>
    %120 = arith.addf %113, %119 : vector<10x128xf32>
    %cst_63 = arith.constant 0.797884583 : f32
    %121 = vector.broadcast %cst_63 : f32 to vector<10x128xf32>
    %122 = arith.mulf %121, %120 : vector<10x128xf32>
    %123 = math.tanh %122 : vector<10x128xf32>
    %cst_64 = arith.constant 1.000000e+00 : f32
    %124 = vector.broadcast %cst_64 : f32 to vector<10x128xf32>
    %125 = arith.addf %124, %123 : vector<10x128xf32>
    %126 = arith.mulf %115, %125 : vector<10x128xf32>
    %c0_65 = arith.constant 0 : index
    %c0_66 = arith.constant 0 : index
    %c0_67 = arith.constant 0 : index
    %127 = vector.load %arg15[%c0_65, %c0_66, %c0_67] : memref<2x128x32xf32, #tpu.memory_space<vmem>>, vector<1x128x32xf32>
    %128 = vector.shape_cast %127 : vector<1x128x32xf32> to vector<128x32xf32>
    %cst_68 = arith.constant dense<0.000000e+00> : vector<10x32xf32>
    %129 = tpu.matmul %126, %128, %cst_68 {dimension_numbers = #tpu.dot_dimension_numbers<[1], [0], [0], [1], [0, 0, 1, 1], [], []>} : vector<10x128xf32>, vector<128x32xf32>, vector<10x32xf32> -> vector<10x32xf32>
    %c0_69 = arith.constant 0 : index
    %c0_70 = arith.constant 0 : index
    %c0_71 = arith.constant 0 : index
    %130 = vector.load %arg16[%c0_69, %c0_70, %c0_71] : memref<2x1x32xf32, #tpu.memory_space<vmem>>, vector<1x1x32xf32>
    %131 = vector.shape_cast %130 : vector<1x1x32xf32> to vector<1x32xf32>
    %132 = vector.broadcast %131 : vector<1x32xf32> to vector<10x32xf32>
    %133 = arith.addf %129, %132 : vector<10x32xf32>
    %134 = arith.addf %82, %133 : vector<10x32xf32>
    %c1 = arith.constant 1 : index
    %c0_72 = arith.constant 0 : index
    %c0_73 = arith.constant 0 : index
    %135 = vector.load %arg5[%c1, %c0_72, %c0_73] : memref<2x1x32xf32, #tpu.memory_space<vmem>>, vector<1x1x32xf32>
    %136 = vector.shape_cast %135 : vector<1x1x32xf32> to vector<1x32xf32>
    %c1_74 = arith.constant 1 : index
    %c0_75 = arith.constant 0 : index
    %c0_76 = arith.constant 0 : index
    %137 = vector.load %arg6[%c1_74, %c0_75, %c0_76] : memref<2x1x32xf32, #tpu.memory_space<vmem>>, vector<1x1x32xf32>
    %138 = vector.shape_cast %137 : vector<1x1x32xf32> to vector<1x32xf32>
    %cst_77 = arith.constant dense<0.000000e+00> : vector<10xf32>
    %139 = vector.multi_reduction <add>, %134, %cst_77 [1] : vector<10x32xf32> to vector<10xf32>
    %140 = vector.shape_cast %139 : vector<10xf32> to vector<10x1xf32>
    %cst_78 = arith.constant 3.200000e+01 : f32
    %141 = vector.broadcast %cst_78 : f32 to vector<10x1xf32>
    %142 = arith.divf %140, %141 : vector<10x1xf32>
    %143 = vector.broadcast %142 : vector<10x1xf32> to vector<10x32xf32>
    %144 = arith.subf %134, %143 : vector<10x32xf32>
    %145 = arith.mulf %144, %144 : vector<10x32xf32>
    %cst_79 = arith.constant dense<0.000000e+00> : vector<10xf32>
    %146 = vector.multi_reduction <add>, %145, %cst_79 [1] : vector<10x32xf32> to vector<10xf32>
    %147 = vector.shape_cast %146 : vector<10xf32> to vector<10x1xf32>
    %cst_80 = arith.constant 3.200000e+01 : f32
    %148 = vector.broadcast %cst_80 : f32 to vector<10x1xf32>
    %149 = arith.divf %147, %148 : vector<10x1xf32>
    %cst_81 = arith.constant 9.99999997E-7 : f32
    %150 = vector.broadcast %cst_81 : f32 to vector<10x1xf32>
    %151 = arith.addf %149, %150 : vector<10x1xf32>
    %152 = math.rsqrt %151 : vector<10x1xf32>
    %153 = vector.broadcast %152 : vector<10x1xf32> to vector<10x32xf32>
    %154 = arith.mulf %144, %153 : vector<10x32xf32>
    %155 = vector.broadcast %136 : vector<1x32xf32> to vector<10x32xf32>
    %156 = arith.mulf %154, %155 : vector<10x32xf32>
    %157 = vector.broadcast %138 : vector<1x32xf32> to vector<10x32xf32>
    %158 = arith.addf %156, %157 : vector<10x32xf32>
    %c1_82 = arith.constant 1 : index
    %c0_83 = arith.constant 0 : index
    %c0_84 = arith.constant 0 : index
    %159 = vector.load %arg7[%c1_82, %c0_83, %c0_84] : memref<2x32x96xf32, #tpu.memory_space<vmem>>, vector<1x32x96xf32>
    %160 = vector.shape_cast %159 : vector<1x32x96xf32> to vector<32x96xf32>
    %cst_85 = arith.constant dense<0.000000e+00> : vector<10x96xf32>
    %161 = tpu.matmul %158, %160, %cst_85 {dimension_numbers = #tpu.dot_dimension_numbers<[1], [0], [0], [1], [0, 0, 1, 1], [], []>} : vector<10x32xf32>, vector<32x96xf32>, vector<10x96xf32> -> vector<10x96xf32>
    %c1_86 = arith.constant 1 : index
    %c0_87 = arith.constant 0 : index
    %c0_88 = arith.constant 0 : index
    %162 = vector.load %arg8[%c1_86, %c0_87, %c0_88] : memref<2x1x96xf32, #tpu.memory_space<vmem>>, vector<1x1x96xf32>
    %163 = vector.shape_cast %162 : vector<1x1x96xf32> to vector<1x96xf32>
    %164 = vector.broadcast %163 : vector<1x96xf32> to vector<10x96xf32>
    %165 = arith.addf %161, %164 : vector<10x96xf32>
    %c1_89 = arith.constant 1 : index
    %c0_90 = arith.constant 0 : index
    %c0_91 = arith.constant 0 : index
    %166 = vector.load %arg9[%c1_89, %c0_90, %c0_91] : memref<2x32x32xf32, #tpu.memory_space<vmem>>, vector<1x32x32xf32>
    %167 = vector.shape_cast %166 : vector<1x32x32xf32> to vector<32x32xf32>
    %168 = vector.extract_strided_slice %165 {offsets = [0, 0], sizes = [10, 16], strides = [1, 1]} : vector<10x96xf32> to vector<10x16xf32>
    %169 = vector.extract_strided_slice %165 {offsets = [0, 32], sizes = [10, 16], strides = [1, 1]} : vector<10x96xf32> to vector<10x16xf32>
    %170 = vector.extract_strided_slice %165 {offsets = [0, 64], sizes = [10, 16], strides = [1, 1]} : vector<10x96xf32> to vector<10x16xf32>
    %cst_92 = arith.constant dense<0.000000e+00> : vector<10x10xf32>
    %171 = tpu.matmul %168, %169, %cst_92 {dimension_numbers = #tpu.dot_dimension_numbers<[1], [1], [0], [0], [0, 0, 1, 0], [], []>} : vector<10x16xf32>, vector<10x16xf32>, vector<10x10xf32> -> vector<10x10xf32>
    %cst_93 = arith.constant 2.500000e-01 : f32
    %172 = vector.broadcast %cst_93 : f32 to vector<10x10xf32>
    %173 = arith.mulf %171, %172 : vector<10x10xf32>
    %174 = arith.addf %173, %5 : vector<10x10xf32>
    %cst_94 = arith.constant dense<0xFF800000> : vector<10xf32>
    %175 = vector.multi_reduction <maximumf>, %174, %cst_94 [1] : vector<10x10xf32> to vector<10xf32>
    %176 = vector.shape_cast %175 : vector<10xf32> to vector<10x1xf32>
    %177 = vector.broadcast %176 : vector<10x1xf32> to vector<10x10xf32>
    %178 = arith.subf %174, %177 : vector<10x10xf32>
    %179 = math.exp %178 : vector<10x10xf32>
    %cst_95 = arith.constant dense<0.000000e+00> : vector<10xf32>
    %180 = vector.multi_reduction <add>, %179, %cst_95 [1] : vector<10x10xf32> to vector<10xf32>
    %181 = vector.shape_cast %180 : vector<10xf32> to vector<10x1xf32>
    %182 = vector.broadcast %181 : vector<10x1xf32> to vector<10x10xf32>
    %183 = arith.divf %179, %182 : vector<10x10xf32>
    %cst_96 = arith.constant dense<0.000000e+00> : vector<10x16xf32>
    %184 = tpu.matmul %183, %170, %cst_96 {dimension_numbers = #tpu.dot_dimension_numbers<[1], [0], [0], [1], [0, 0, 1, 1], [], []>} : vector<10x10xf32>, vector<10x16xf32>, vector<10x16xf32> -> vector<10x16xf32>
    %185 = vector.extract_strided_slice %167 {offsets = [0, 0], sizes = [16, 32], strides = [1, 1]} : vector<32x32xf32> to vector<16x32xf32>
    %cst_97 = arith.constant dense<0.000000e+00> : vector<10x32xf32>
    %186 = tpu.matmul %184, %185, %cst_97 {dimension_numbers = #tpu.dot_dimension_numbers<[1], [0], [0], [1], [0, 0, 1, 1], [], []>} : vector<10x16xf32>, vector<16x32xf32>, vector<10x32xf32> -> vector<10x32xf32>
    %187 = vector.extract_strided_slice %165 {offsets = [0, 16], sizes = [10, 16], strides = [1, 1]} : vector<10x96xf32> to vector<10x16xf32>
    %188 = vector.extract_strided_slice %165 {offsets = [0, 48], sizes = [10, 16], strides = [1, 1]} : vector<10x96xf32> to vector<10x16xf32>
    %189 = vector.extract_strided_slice %165 {offsets = [0, 80], sizes = [10, 16], strides = [1, 1]} : vector<10x96xf32> to vector<10x16xf32>
    %cst_98 = arith.constant dense<0.000000e+00> : vector<10x10xf32>
    %190 = tpu.matmul %187, %188, %cst_98 {dimension_numbers = #tpu.dot_dimension_numbers<[1], [1], [0], [0], [0, 0, 1, 0], [], []>} : vector<10x16xf32>, vector<10x16xf32>, vector<10x10xf32> -> vector<10x10xf32>
    %cst_99 = arith.constant 2.500000e-01 : f32
    %191 = vector.broadcast %cst_99 : f32 to vector<10x10xf32>
    %192 = arith.mulf %190, %191 : vector<10x10xf32>
    %193 = arith.addf %192, %5 : vector<10x10xf32>
    %cst_100 = arith.constant dense<0xFF800000> : vector<10xf32>
    %194 = vector.multi_reduction <maximumf>, %193, %cst_100 [1] : vector<10x10xf32> to vector<10xf32>
    %195 = vector.shape_cast %194 : vector<10xf32> to vector<10x1xf32>
    %196 = vector.broadcast %195 : vector<10x1xf32> to vector<10x10xf32>
    %197 = arith.subf %193, %196 : vector<10x10xf32>
    %198 = math.exp %197 : vector<10x10xf32>
    %cst_101 = arith.constant dense<0.000000e+00> : vector<10xf32>
    %199 = vector.multi_reduction <add>, %198, %cst_101 [1] : vector<10x10xf32> to vector<10xf32>
    %200 = vector.shape_cast %199 : vector<10xf32> to vector<10x1xf32>
    %201 = vector.broadcast %200 : vector<10x1xf32> to vector<10x10xf32>
    %202 = arith.divf %198, %201 : vector<10x10xf32>
    %cst_102 = arith.constant dense<0.000000e+00> : vector<10x16xf32>
    %203 = tpu.matmul %202, %189, %cst_102 {dimension_numbers = #tpu.dot_dimension_numbers<[1], [0], [0], [1], [0, 0, 1, 1], [], []>} : vector<10x10xf32>, vector<10x16xf32>, vector<10x16xf32> -> vector<10x16xf32>
    %204 = vector.extract_strided_slice %167 {offsets = [16, 0], sizes = [16, 32], strides = [1, 1]} : vector<32x32xf32> to vector<16x32xf32>
    %cst_103 = arith.constant dense<0.000000e+00> : vector<10x32xf32>
    %205 = tpu.matmul %203, %204, %cst_103 {dimension_numbers = #tpu.dot_dimension_numbers<[1], [0], [0], [1], [0, 0, 1, 1], [], []>} : vector<10x16xf32>, vector<16x32xf32>, vector<10x32xf32> -> vector<10x32xf32>
    %206 = arith.addf %186, %205 : vector<10x32xf32>
    %207 = arith.addf %134, %206 : vector<10x32xf32>
    %c1_104 = arith.constant 1 : index
    %c0_105 = arith.constant 0 : index
    %c0_106 = arith.constant 0 : index
    %208 = vector.load %arg10[%c1_104, %c0_105, %c0_106] : memref<2x1x32xf32, #tpu.memory_space<vmem>>, vector<1x1x32xf32>
    %209 = vector.shape_cast %208 : vector<1x1x32xf32> to vector<1x32xf32>
    %210 = vector.broadcast %209 : vector<1x32xf32> to vector<10x32xf32>
    %211 = arith.addf %207, %210 : vector<10x32xf32>
    %c1_107 = arith.constant 1 : index
    %c0_108 = arith.constant 0 : index
    %c0_109 = arith.constant 0 : index
    %212 = vector.load %arg11[%c1_107, %c0_108, %c0_109] : memref<2x1x32xf32, #tpu.memory_space<vmem>>, vector<1x1x32xf32>
    %213 = vector.shape_cast %212 : vector<1x1x32xf32> to vector<1x32xf32>
    %c1_110 = arith.constant 1 : index
    %c0_111 = arith.constant 0 : index
    %c0_112 = arith.constant 0 : index
    %214 = vector.load %arg12[%c1_110, %c0_111, %c0_112] : memref<2x1x32xf32, #tpu.memory_space<vmem>>, vector<1x1x32xf32>
    %215 = vector.shape_cast %214 : vector<1x1x32xf32> to vector<1x32xf32>
    %cst_113 = arith.constant dense<0.000000e+00> : vector<10xf32>
    %216 = vector.multi_reduction <add>, %211, %cst_113 [1] : vector<10x32xf32> to vector<10xf32>
    %217 = vector.shape_cast %216 : vector<10xf32> to vector<10x1xf32>
    %cst_114 = arith.constant 3.200000e+01 : f32
    %218 = vector.broadcast %cst_114 : f32 to vector<10x1xf32>
    %219 = arith.divf %217, %218 : vector<10x1xf32>
    %220 = vector.broadcast %219 : vector<10x1xf32> to vector<10x32xf32>
    %221 = arith.subf %211, %220 : vector<10x32xf32>
    %222 = arith.mulf %221, %221 : vector<10x32xf32>
    %cst_115 = arith.constant dense<0.000000e+00> : vector<10xf32>
    %223 = vector.multi_reduction <add>, %222, %cst_115 [1] : vector<10x32xf32> to vector<10xf32>
    %224 = vector.shape_cast %223 : vector<10xf32> to vector<10x1xf32>
    %cst_116 = arith.constant 3.200000e+01 : f32
    %225 = vector.broadcast %cst_116 : f32 to vector<10x1xf32>
    %226 = arith.divf %224, %225 : vector<10x1xf32>
    %cst_117 = arith.constant 9.99999997E-7 : f32
    %227 = vector.broadcast %cst_117 : f32 to vector<10x1xf32>
    %228 = arith.addf %226, %227 : vector<10x1xf32>
    %229 = math.rsqrt %228 : vector<10x1xf32>
    %230 = vector.broadcast %229 : vector<10x1xf32> to vector<10x32xf32>
    %231 = arith.mulf %221, %230 : vector<10x32xf32>
    %232 = vector.broadcast %213 : vector<1x32xf32> to vector<10x32xf32>
    %233 = arith.mulf %231, %232 : vector<10x32xf32>
    %234 = vector.broadcast %215 : vector<1x32xf32> to vector<10x32xf32>
    %235 = arith.addf %233, %234 : vector<10x32xf32>
    %c1_118 = arith.constant 1 : index
    %c0_119 = arith.constant 0 : index
    %c0_120 = arith.constant 0 : index
    %236 = vector.load %arg13[%c1_118, %c0_119, %c0_120] : memref<2x32x128xf32, #tpu.memory_space<vmem>>, vector<1x32x128xf32>
    %237 = vector.shape_cast %236 : vector<1x32x128xf32> to vector<32x128xf32>
    %cst_121 = arith.constant dense<0.000000e+00> : vector<10x128xf32>
    %238 = tpu.matmul %235, %237, %cst_121 {dimension_numbers = #tpu.dot_dimension_numbers<[1], [0], [0], [1], [0, 0, 1, 1], [], []>} : vector<10x32xf32>, vector<32x128xf32>, vector<10x128xf32> -> vector<10x128xf32>
    %c1_122 = arith.constant 1 : index
    %c0_123 = arith.constant 0 : index
    %c0_124 = arith.constant 0 : index
    %239 = vector.load %arg14[%c1_122, %c0_123, %c0_124] : memref<2x1x128xf32, #tpu.memory_space<vmem>>, vector<1x1x128xf32>
    %240 = vector.shape_cast %239 : vector<1x1x128xf32> to vector<1x128xf32>
    %241 = vector.broadcast %240 : vector<1x128xf32> to vector<10x128xf32>
    %242 = arith.addf %238, %241 : vector<10x128xf32>
    %cst_125 = arith.constant 5.000000e-01 : f32
    %243 = vector.broadcast %cst_125 : f32 to vector<10x128xf32>
    %244 = arith.mulf %243, %242 : vector<10x128xf32>
    %cst_126 = arith.constant 4.471500e-02 : f32
    %245 = vector.broadcast %cst_126 : f32 to vector<10x128xf32>
    %246 = arith.mulf %245, %242 : vector<10x128xf32>
    %247 = arith.mulf %246, %242 : vector<10x128xf32>
    %248 = arith.mulf %247, %242 : vector<10x128xf32>
    %249 = arith.addf %242, %248 : vector<10x128xf32>
    %cst_127 = arith.constant 0.797884583 : f32
    %250 = vector.broadcast %cst_127 : f32 to vector<10x128xf32>
    %251 = arith.mulf %250, %249 : vector<10x128xf32>
    %252 = math.tanh %251 : vector<10x128xf32>
    %cst_128 = arith.constant 1.000000e+00 : f32
    %253 = vector.broadcast %cst_128 : f32 to vector<10x128xf32>
    %254 = arith.addf %253, %252 : vector<10x128xf32>
    %255 = arith.mulf %244, %254 : vector<10x128xf32>
    %c1_129 = arith.constant 1 : index
    %c0_130 = arith.constant 0 : index
    %c0_131 = arith.constant 0 : index
    %256 = vector.load %arg15[%c1_129, %c0_130, %c0_131] : memref<2x128x32xf32, #tpu.memory_space<vmem>>, vector<1x128x32xf32>
    %257 = vector.shape_cast %256 : vector<1x128x32xf32> to vector<128x32xf32>
    %cst_132 = arith.constant dense<0.000000e+00> : vector<10x32xf32>
    %258 = tpu.matmul %255, %257, %cst_132 {dimension_numbers = #tpu.dot_dimension_numbers<[1], [0], [0], [1], [0, 0, 1, 1], [], []>} : vector<10x128xf32>, vector<128x32xf32>, vector<10x32xf32> -> vector<10x32xf32>
    %c1_133 = arith.constant 1 : index
    %c0_134 = arith.constant 0 : index
    %c0_135 = arith.constant 0 : index
    %259 = vector.load %arg16[%c1_133, %c0_134, %c0_135] : memref<2x1x32xf32, #tpu.memory_space<vmem>>, vector<1x1x32xf32>
    %260 = vector.shape_cast %259 : vector<1x1x32xf32> to vector<1x32xf32>
    %261 = vector.broadcast %260 : vector<1x32xf32> to vector<10x32xf32>
    %262 = arith.addf %258, %261 : vector<10x32xf32>
    %263 = arith.addf %211, %262 : vector<10x32xf32>
    %c0_136 = arith.constant 0 : index
    %c0_137 = arith.constant 0 : index
    %264 = vector.load %arg2[%c0_136, %c0_137] : memref<2x10xf32, #tpu.memory_space<vmem>>, vector<2x10xf32>
    %cst_138 = arith.constant dense<0.000000e+00> : vector<2x32xf32>
    %265 = tpu.matmul %264, %263, %cst_138 {dimension_numbers = #tpu.dot_dimension_numbers<[1], [0], [0], [1], [0, 0, 1, 1], [], []>} : vector<2x10xf32>, vector<10x32xf32>, vector<2x32xf32> -> vector<2x32xf32>
    %c0_139 = arith.constant 0 : index
    %c0_140 = arith.constant 0 : index
    %266 = vector.load %arg17[%c0_139, %c0_140] : memref<1x32xf32, #tpu.memory_space<vmem>>, vector<1x32xf32>
    %c0_141 = arith.constant 0 : index
    %c0_142 = arith.constant 0 : index
    %267 = vector.load %arg18[%c0_141, %c0_142] : memref<1x32xf32, #tpu.memory_space<vmem>>, vector<1x32xf32>
    %cst_143 = arith.constant dense<0.000000e+00> : vector<2xf32>
    %268 = vector.multi_reduction <add>, %265, %cst_143 [1] : vector<2x32xf32> to vector<2xf32>
    %269 = vector.shape_cast %268 : vector<2xf32> to vector<2x1xf32>
    %cst_144 = arith.constant 3.200000e+01 : f32
    %270 = vector.broadcast %cst_144 : f32 to vector<2x1xf32>
    %271 = arith.divf %269, %270 : vector<2x1xf32>
    %272 = vector.broadcast %271 : vector<2x1xf32> to vector<2x32xf32>
    %273 = arith.subf %265, %272 : vector<2x32xf32>
    %274 = arith.mulf %273, %273 : vector<2x32xf32>
    %cst_145 = arith.constant dense<0.000000e+00> : vector<2xf32>
    %275 = vector.multi_reduction <add>, %274, %cst_145 [1] : vector<2x32xf32> to vector<2xf32>
    %276 = vector.shape_cast %275 : vector<2xf32> to vector<2x1xf32>
    %cst_146 = arith.constant 3.200000e+01 : f32
    %277 = vector.broadcast %cst_146 : f32 to vector<2x1xf32>
    %278 = arith.divf %276, %277 : vector<2x1xf32>
    %cst_147 = arith.constant 9.99999997E-7 : f32
    %279 = vector.broadcast %cst_147 : f32 to vector<2x1xf32>
    %280 = arith.addf %278, %279 : vector<2x1xf32>
    %281 = math.rsqrt %280 : vector<2x1xf32>
    %282 = vector.broadcast %281 : vector<2x1xf32> to vector<2x32xf32>
    %283 = arith.mulf %273, %282 : vector<2x32xf32>
    %284 = vector.broadcast %266 : vector<1x32xf32> to vector<2x32xf32>
    %285 = arith.mulf %283, %284 : vector<2x32xf32>
    %286 = vector.broadcast %267 : vector<1x32xf32> to vector<2x32xf32>
    %287 = arith.addf %285, %286 : vector<2x32xf32>
    %c0_148 = arith.constant 0 : index
    %c0_149 = arith.constant 0 : index
    %288 = vector.load %arg19[%c0_148, %c0_149] : memref<1x32xf32, #tpu.memory_space<vmem>>, vector<1x32xf32>
    %c0_150 = arith.constant 0 : index
    %c0_151 = arith.constant 0 : index
    %289 = vector.load %arg20[%c0_150, %c0_151] : memref<1x32xf32, #tpu.memory_space<vmem>>, vector<1x32xf32>
    %cst_152 = arith.constant dense<0.000000e+00> : vector<2xf32>
    %290 = vector.multi_reduction <add>, %287, %cst_152 [1] : vector<2x32xf32> to vector<2xf32>
    %291 = vector.shape_cast %290 : vector<2xf32> to vector<2x1xf32>
    %cst_153 = arith.constant 3.200000e+01 : f32
    %292 = vector.broadcast %cst_153 : f32 to vector<2x1xf32>
    %293 = arith.divf %291, %292 : vector<2x1xf32>
    %294 = vector.broadcast %293 : vector<2x1xf32> to vector<2x32xf32>
    %295 = arith.subf %287, %294 : vector<2x32xf32>
    %296 = arith.mulf %295, %295 : vector<2x32xf32>
    %cst_154 = arith.constant dense<0.000000e+00> : vector<2xf32>
    %297 = vector.multi_reduction <add>, %296, %cst_154 [1] : vector<2x32xf32> to vector<2xf32>
    %298 = vector.shape_cast %297 : vector<2xf32> to vector<2x1xf32>
    %cst_155 = arith.constant 3.200000e+01 : f32
    %299 = vector.broadcast %cst_155 : f32 to vector<2x1xf32>
    %300 = arith.divf %298, %299 : vector<2x1xf32>
    %cst_156 = arith.constant 9.99999997E-7 : f32
    %301 = vector.broadcast %cst_156 : f32 to vector<2x1xf32>
    %302 = arith.addf %300, %301 : vector<2x1xf32>
    %303 = math.rsqrt %302 : vector<2x1xf32>
    %304 = vector.broadcast %303 : vector<2x1xf32> to vector<2x32xf32>
    %305 = arith.mulf %295, %304 : vector<2x32xf32>
    %306 = vector.broadcast %288 : vector<1x32xf32> to vector<2x32xf32>
    %307 = arith.mulf %305, %306 : vector<2x32xf32>
    %308 = vector.broadcast %289 : vector<1x32xf32> to vector<2x32xf32>
    %309 = arith.addf %307, %308 : vector<2x32xf32>
    %c0_157 = arith.constant 0 : index
    %c0_158 = arith.constant 0 : index
    %310 = vector.load %arg21[%c0_157, %c0_158] : memref<32x128xf32, #tpu.memory_space<vmem>>, vector<32x128xf32>
    %cst_159 = arith.constant dense<0.000000e+00> : vector<2x128xf32>
    %311 = tpu.matmul %309, %310, %cst_159 {dimension_numbers = #tpu.dot_dimension_numbers<[1], [0], [0], [1], [0, 0, 1, 1], [], []>} : vector<2x32xf32>, vector<32x128xf32>, vector<2x128xf32> -> vector<2x128xf32>
    %c0_160 = arith.constant 0 : index
    %c0_161 = arith.constant 0 : index
    %312 = vector.load %arg22[%c0_160, %c0_161] : memref<1x128xf32, #tpu.memory_space<vmem>>, vector<1x128xf32>
    %313 = vector.broadcast %312 : vector<1x128xf32> to vector<2x128xf32>
    %314 = arith.addf %311, %313 : vector<2x128xf32>
    %c0_162 = arith.constant 0 : index
    %c0_163 = arith.constant 0 : index
    %315 = vector.load %arg23[%c0_162, %c0_163] : memref<2x128xf32, #tpu.memory_space<vmem>>, vector<2x128xf32>
    tpu.vector_store %arg23[%c0_162, %c0_163], %314 {strides = array<i32>} : memref<2x128xf32, #tpu.memory_space<vmem>>, vector<2x128xf32>,
    return
  }
}

</mosaic_0001>

<bundles_post_ra>
// kernel: forward.1
= control target key start
LH: loop header
LB: loop body
LE: loop exit
PB: predicated region body
PF: predicated region fallthrough
CT: control target
= control target key end

     0   :  { %s3636_s0 = inlined_call_operand.vmem [shape: f32[10,193], index: 0, kind: input, shape index: {}]   ;;  %s3637_s1 = inlined_call_operand.vmem [shape: f32[10,10], index: 1, kind: input, shape index: {}]   ;;  %s3638_s2 = inlined_call_operand.vmem [shape: f32[2,10], index: 2, kind: input, shape index: {}]   ;;  %s3639_s3 = inlined_call_operand.vmem [shape: f32[193,32], index: 3, kind: input, shape index: {}]   ;;  %s3640_s4 = inlined_call_operand.vmem [shape: f32[10,32], index: 4, kind: input, shape index: {}]   ;;  %s3641_s5 = inlined_call_operand.vmem [shape: f32[2,1,32], index: 5, kind: input, shape index: {}]   ;;  %s3642_s6 = inlined_call_operand.vmem [shape: f32[2,1,32], index: 6, kind: input, shape index: {}]   ;;  %s3643_s7 = inlined_call_operand.vmem [shape: f32[2,32,96], index: 7, kind: input, shape index: {}]   ;;  %s3644_s8 = inlined_call_operand.vmem [shape: f32[2,1,96], index: 8, kind: input, shape index: {}]   ;;  %s3645_s9 = inlined_call_operand.vmem [shape: f32[2,32,32], index: 9, kind: input, shape index: {}]   ;;  %s3646_s10 = inlined_call_operand.vmem [shape: f32[2,1,32], index: 10, kind: input, shape index: {}]   ;;  %s3647_s11 = inlined_call_operand.vmem [shape: f32[2,1,32], index: 11, kind: input, shape index: {}]   ;;  %s3648_s12 = inlined_call_operand.vmem [shape: f32[2,1,32], index: 12, kind: input, shape index: {}]   ;;  %s3649_s13 = inlined_call_operand.vmem [shape: f32[2,32,128], index: 13, kind: input, shape index: {}]   ;;  %s3650_s14 = inlined_call_operand.vmem [shape: f32[2,1,128], index: 14, kind: input, shape index: {}]   ;;  %s3651_s15 = inlined_call_operand.vmem [shape: f32[2,128,32], index: 15, kind: input, shape index: {}]   ;;  %s3652_s16 = inlined_call_operand.vmem [shape: f32[2,1,32], index: 16, kind: input, shape index: {}]   ;;  %s3653_s17 = inlined_call_operand.vmem [shape: f32[1,32], index: 17, kind: input, shape index: {}]   ;;  %s3654_s18 = inlined_call_operand.vmem [shape: f32[1,32], index: 18, kind: input, shape index: {}]   ;;  %s3655_s19 = inlined_call_operand.vmem [shape: f32[1,32], index: 19, kind: input, shape index: {}]   ;;  %s3656_s20 = inlined_call_operand.vmem [shape: f32[1,32], index: 20, kind: input, shape index: {}]   ;;  %s3657_s21 = inlined_call_operand.vmem [shape: f32[32,128], index: 21, kind: input, shape index: {}]   ;;  %s3658_s22 = inlined_call_operand.vmem [shape: f32[1,128], index: 22, kind: input, shape index: {}]   ;;  %s3659_s23 = inlined_call_operand.hbm [shape: f32[2,128], index: 23, kind: output, shape index: {}]  }
   0x1   :  { %3669 = sst [smem:[#allocation5_spill]] %s3636_s0 }
   0x2   :  { %3670 = sst [smem:[#allocation6_spill]] %s3637_s1 }
   0x3   :  { %3671 = sst [smem:[#allocation7_spill]] %s3638_s2 }
   0x4   :  { %3672 = sst [smem:[#allocation8_spill]] %s3639_s3 }
   0x5   :  { %3673 = sst [smem:[#allocation9_spill]] %s3640_s4 }
   0x6   :  { %3674 = sst [smem:[#allocation10_spill]] %s3641_s5 }
   0x7   :  { %3675 = sst [smem:[#allocation11_spill]] %s3642_s6 }
   0x8   :  { %3676 = sst [smem:[#allocation12_spill]] %s3643_s7 }
   0x9   :  { %s3677_s24 = sld [smem:[#allocation8_spill]]  ;;  %v2926_v1 = vmov 0.0   ;;  %vm106_vm0 = vcmask 531456  }
   0xa   :  { %117 = vmatprep.subr.mxu0 %v2926_v1  ;;  %s3678_s3 = sld [smem:[#allocation5_spill]] }
   0xf   :  { %v94_v0 = vld [vmem:[%s3677_s24 + $0x78] sm:$0xff]  ;;  %v93_v2 = vld [vmem:[%s3677_s24 + $0x70] sm:$0xff]  ;;  %v92_v3 = vld [vmem:[%s3677_s24 + $0x68] sm:$0xff] }
  0x10   :  { %118 = vmatpush1.msra.mxu0 %v94_v0  ;;  %v91_v4 = vld [vmem:[%s3677_s24 + $0x60] sm:$0xff]  ;;  %v90_v5 = vld [vmem:[%s3677_s24 + $0x58] sm:$0xff]  ;;  %v76_v6 = vld [vmem:[%s3678_s3 + $0x8] sm:$0xff] }
  0x11   :  { %119 = vmatprep.subr.mxu0 %v2926_v1  ;;  %v89_v7 = vld [vmem:[%s3677_s24 + $0x50] sm:$0xff]  ;;  %2398 = vmatprep.mubr.msk.f32.mxu0 %vm106_vm0, %v76_v6 }
  0x12   :  { %120 = vmatpush1.msra.mxu0 %v93_v2 }
  0x13   :  { %121 = vmatprep.subr.mxu0 %v2926_v1 }
  0x14   :  { %122 = vmatpush1.msra.mxu0 %v92_v3 }
  0x15   :  { %123 = vmatprep.subr.mxu0 %v2926_v1 }
  0x16   :  { %124 = vmatpush1.msra.mxu0 %v91_v4 }
  0x17   :  { %125 = vmatprep.subr.mxu0 %v2926_v1 }
  0x18   :  { %126 = vmatpush1.msra.mxu0 %v90_v5 }
  0x19   :  { %28 = vsyncpa [#allocation3], 0  ;;  %127 = vmatprep.subr.mxu0 %v2926_v1  ;;  %v88_v8 = vld [vmem:[%s3677_s24 + $0x48] sm:$0xff]  ;;  %v87_v9 = vld [vmem:[%s3677_s24 + $0x40] sm:$0xff]  ;;  %vm113_vm1 = vcmask 1040384   ;;  %s3679_s6 = sld [smem:[#allocation9_spill]] }
  0x1a   :  { %128 = vmatpush1.msra.mxu0 %v89_v7  ;;  %v86_v10 = vld [vmem:[%s3677_s24 + $0x38] sm:$0xff]  ;;  %v85_v11 = vld [vmem:[%s3677_s24 + $0x30] sm:$0xff]  ;;  %v84_v12 = vld [vmem:[%s3677_s24 + $0x28] sm:$0xff]  ;;  %vm196_vm2 = vcmask 261120   ;;  %vm200_vm3 = vcmask 254976   ;;  %s3680_s29 = sld [smem:[#allocation12_spill]] }
  0x1b   :  { %129 = vmatprep.subr.mxu0 %v2926_v1  ;;  %v83_v13 = vld [vmem:[%s3677_s24 + $0x20] sm:$0xff]  ;;  %v82_v14 = vld [vmem:[%s3677_s24 + $0x18] sm:$0xff]  ;;  %v81_v15 = vld [vmem:[%s3677_s24 + $0x10] sm:$0xff]  ;;  %s3681_s2 = sld [smem:[#allocation10_spill]]  ;;  %vm343_vm4 = vcmask 130048   ;;  %s2927_s0 = smov 96  }
  0x1c   :  { %130 = vmatpush1.msra.mxu0 %v88_v8  ;;  %v80_v16 = vld [vmem:[%s3677_s24 + $0x8] sm:$0xff]  ;;  %v79_v17 = vld [vmem:[%s3677_s24] sm:$0xff]  ;;  %v102_v19 = vld [vmem:[%s3677_s24 + $0xb8] sm:$0xff]  ;;  %s3682_s7 = sld [smem:[#allocation11_spill]]  ;;  %vm435_vm5 = vcmask 74752   ;;  %vm431_vm6 = vcmask 80896  }
  0x1d   :  { %131 = vmatprep.subr.mxu0 %v2926_v1  ;;  %v103_v18 = vld [vmem:[%s3677_s24 + $0xc0] sm:$0x1]  ;;  %v101_v20 = vld [vmem:[%s3677_s24 + $0xb0] sm:$0xff]  ;;  %v100_v21 = vld [vmem:[%s3677_s24 + $0xa8] sm:$0xff]  ;;  %s3683_s25 = sld [smem:[#allocation6_spill]]  ;;  %s2928_s26 = smov 64  }
  0x1e   :  { %132 = vmatpush1.msra.mxu0 %v87_v9  ;;  %v99_v22 = vld [vmem:[%s3677_s24 + $0xa0] sm:$0xff]  ;;  %v98_v23 = vld [vmem:[%s3677_s24 + $0x98] sm:$0xff]  ;;  %v97_v24 = vld [vmem:[%s3677_s24 + $0x90] sm:$0xff]  ;;  %vm466_vm7 = vcmask 1041408   ;;  %s3667_s27 = smov 48   ;;  %vm2932_vm8 = vmmov 0  }
  0x1f   :  { %133 = vmatprep.subr.mxu0 %v2926_v1  ;;  %v96_v25 = vld [vmem:[%s3677_s24 + $0x88] sm:$0xff]  ;;  %v95_v26 = vld [vmem:[%s3677_s24 + $0x80] sm:$0xff]  ;;  %v78_v28 = vld [vmem:[%s3678_s3 + $0x18] sm:$0x3]  ;;  %s2929_s24 = smov 80   ;;  %s3685_s1 = sld [smem:[#allocation7_spill]] }
  0x20   :  { %134 = vmatpush1.msra.mxu0 %v86_v10  ;;  %v75_v27 = vld [vmem:[%s3678_s3] sm:$0xff]  ;;  %v77_v29 = vld [vmem:[%s3678_s3 + $0x10] sm:$0x3]  ;;  %v105_v34 = vld [vmem:[%s3679_s6 + $0x8] sm:$0x3] }
  0x21   :  { %135 = vmatprep.subr.mxu0 %v2926_v1  ;;  %v104_v30 = vld [vmem:[%s3679_s6] sm:$0xff]  ;;  %v244_v50 = vld [vmem:[%s3680_s29 + $0x18] sm:$0xff]  ;;  %v243_v51 = vld [vmem:[%s3680_s29 + $0x10] sm:$0xff]  ;;  %s2930_s6 = smov 112  }
  0x22   :  { %136 = vmatpush1.msra.mxu0 %v85_v11  ;;  %2620 = vmatprep.subr.mxu1 %v244_v50  ;;  %v242_v52 = vld [vmem:[%s3680_s29 + $0x8] sm:$0xff]  ;;  %v241_v53 = vld [vmem:[%s3680_s29] sm:$0xff] }
  0x23   :  { %137 = vmatprep.subr.mxu0 %v2926_v1  ;;  %2621 = vmatpush3.msra.mxu1 %v244_v50  ;;  %v2400_v61 = vld [vmem:[%s3681_s2] ss:$0 sm:$0xff] }
  0x24   :  { %138 = vmatpush1.msra.mxu0 %v84_v12  ;;  %2622 = vmatprep.subr.mxu1 %v243_v51  ;;  %v2401_v63 = vld [vmem:[%s3682_s7] ss:$0 sm:$0xff] }
  0x25   :  { %139 = vmatprep.subr.mxu0 %v2926_v1  ;;  %2623 = vmatpush3.msra.mxu1 %v243_v51  ;;  %v2402_v7 = vld [vmem:[%s3644_s8] ss:$0 sm:$0xff] }
  0x26   :  { %140 = vmatpush1.msra.mxu0 %v83_v13  ;;  %2624 = vmatprep.subr.mxu1 %v242_v52 }
  0x27   :  { %141 = vmatprep.subr.mxu0 %v2926_v1  ;;  %2625 = vmatpush3.msra.mxu1 %v242_v52 }
  0x28   :  { %142 = vmatpush1.msra.mxu0 %v82_v14  ;;  %2626 = vmatprep.subr.mxu1 %v241_v53 }
  0x29   :  { %143 = vmatprep.subr.mxu0 %v2926_v1  ;;  %2627 = vmatpush3.msra.mxu1 %v241_v53 }
  0x2a   :  { %144 = vmatpush1.msra.mxu0 %v81_v15  ;;  %v3228_v15 = vld [vmem:[%s3683_s25 + $0x8] sm:$0x3] }
  0x2b   :  { %145 = vmatprep.subr.mxu0 %v2926_v1 }
  0x2c   :  { %146 = vmatpush1.msra.mxu0 %v80_v16 }
  0x2d   :  { %147 = vmatprep.subr.mxu0 %v2926_v1 }
  0x2e   :  { %148 = vmatpush1.msra.mxu0 %v79_v17 }
  0x2f   :  { %163 = vmatprep.subr.mxu0 %v2926_v1 }
  0x30   :  { %2397 = vmatpush2.msk.msra.mxu0 %vm113_vm1, %v103_v18  ;;  %v3233_v18 = vld [vmem:[%s3683_s25] sm:$0xff] }
  0x31   :  { %165 = vmatprep.subr.mxu0 %v2926_v1 }
  0x32   :  { %166 = vmatpush2.msra.mxu0 %v102_v19 }
  0x33   :  { %167 = vmatprep.subr.mxu0 %v2926_v1 }
  0x34   :  { %168 = vmatpush2.msra.mxu0 %v101_v20 }
  0x35   :  { %169 = vmatprep.subr.mxu0 %v2926_v1 }
  0x36   :  { %170 = vmatpush2.msra.mxu0 %v100_v21 }
  0x37   :  { %171 = vmatprep.subr.mxu0 %v2926_v1 }
  0x38   :  { %172 = vmatpush2.msra.mxu0 %v99_v22 }
  0x39   :  { %173 = vmatprep.subr.mxu0 %v2926_v1 }
  0x3a   :  { %174 = vmatpush2.msra.mxu0 %v98_v23 }
  0x3b   :  { %175 = vmatprep.subr.mxu0 %v2926_v1 }
  0x3c   :  { %176 = vmatpush2.msra.mxu0 %v97_v24 }
  0x3d   :  { %177 = vmatprep.subr.mxu0 %v2926_v1 }
  0x3e   :  { %178 = vmatpush2.msra.mxu0 %v96_v25 }
  0x3f   :  { %179 = vmatprep.subr.mxu0 %v2926_v1 }
  0x40   :  { %180 = vmatpush2.msra.mxu0 %v95_v26 }
  0x41   :  { %182 = vmatmul.mubr.f32.vlgmr.msra.gmra.mxu0 %v75_v27 }
  0x42   :  { %2399 = vmatprep.mubr.msk.f32.mxu0 %vm106_vm0, %v78_v28 }
  0x45   :  { %187 = vmatmul.mubr.f32.gmra.mxu0 %v77_v29 }
 0x101   :  { %v183_v31 = vpop.f32.mrf.mxu0 }
 0x102   :  { %v3171_v32 = vadd.f32 %v183_v31, %v104_v30 }
 0x103   :  { %v185_v33 = vpop.f32.mrf.mxu0 }
 0x104   :  { %v197_v35 = vsel %vm196_vm2, %v3171_v32, 0.0 }
 0x105   :  { %v188_v36 = vpop.f32.mrf.mxu0  ;;  %198 = vadd.xlane.f32.xlu0 %v197_v35 }
 0x106   :  { %v3178_v37 = vadd.f32 %v188_v36, %v105_v34 }
 0x107   :  { %v190_v38 = vpop.f32.mrf.mxu0 }
 0x108   :  { %v201_v39 = vsel %vm200_vm3, %v3178_v37, 0.0 }
 0x109   :  { %202 = vadd.xlane.f32.xlu0 %v201_v39 }
 0x18e   :  { %v199_v40 = vpop.xlane.xlu0 %198 }
 0x18f   :  { %v205_v41 = vmul.f32 0.03125, %v199_v40 }
 0x191   :  { %v207_v42 = vsub.f32 %v3171_v32, %v205_v41 }
 0x192   :  { %v203_v43 = vpop.xlane.xlu0 %202 }
 0x193   :  { %v206_v44 = vmul.f32 0.03125, %v203_v43  ;;  %v209_v45 = vmul.f32 %v207_v42, %v207_v42 }
 0x195   :  { %v208_v46 = vsub.f32 %v3178_v37, %v206_v44  ;;  %v211_v47 = vsel %vm196_vm2, %v209_v45, 0.0 }
 0x196   :  { %212 = vadd.xlane.f32.xlu1 %v211_v47 }
 0x197   :  { %v210_v48 = vmul.f32 %v208_v46, %v208_v46 }
 0x199   :  { %v214_v49 = vsel %vm200_vm3, %v210_v48, 0.0 }
 0x19a   :  { %215 = vadd.xlane.f32.xlu1 %v214_v49 }
 0x21f   :  { %v213_v54 = vpop.xlane.xlu1 %212 }
 0x220   :  { %v217_v55 = vmul.f32 0.03125, %v213_v54 }
 0x222   :  { %v219_v56 = vadd.f32 1e-06, %v217_v55 }
 0x223   :  { %v216_v57 = vpop.xlane.xlu1 %215 }
 0x224   :  { %2844 = vrsqrt.f32 %v219_v56  ;;  %v218_v58 = vmul.f32 0.03125, %v216_v57 }
 0x226   :  { %v220_v59 = vadd.f32 1e-06, %v218_v58 }
 0x228   :  { %2846 = vrsqrt.f32 %v220_v59 }
 0x231   :  { %v2845_v60 = vpop.eup %2844 }
 0x232   :  { %v223_v62 = vmul.f32 %v2845_v60, %v207_v42 }
 0x234   :  { %v231_v0 = vmul.f32 %v2400_v61, %v223_v62 }
 0x235   :  { %v2847_v2 = vpop.eup %2846 }
 0x236   :  { %v224_v3 = vmul.f32 %v2847_v2, %v208_v46  ;;  %v239_v4 = vadd.f32 %v2401_v63, %v231_v0 }
 0x238   :  { %v232_v5 = vmul.f32 %v2400_v61, %v224_v3  ;;  %2628 = vmatprep.mubr.msk.f32.mxu1 %vm196_vm2, %v239_v4 }
 0x23a   :  { %v240_v6 = vadd.f32 %v2401_v63, %v232_v5 }
 0x23c   :  { %2629 = vmatmul.mubr.msk.f32.vlgmr.msra.gmra.mxu1 %vm196_vm2, %v240_v6 }
 0x2fc   :  { %v2630_v8 = vpop.f32.mrf.mxu1 }
 0x2fd   :  { %v3209_v9 = vadd.f32 %v2630_v8, %v2402_v7 }
 0x2fe   :  { %v324_v10 = vpop.f32.mrf.mxu1 }
 0x2ff   :  { %v3211_v11 = vadd.f32 %v2402_v7, %v324_v10  ;;  %341 = vrot.lane.b32.xlu0 %v3209_v9, %s2927_s0 }
 0x301   :  { %339 = vrot.lane.b32.xlu1 %v3211_v11, %s2927_s0  ;;  %2635 = vmatprep.mubr.msk.f32.mxu1 %vm343_vm4, %v3211_v11 }
 0x371   :  { %v342_v12 = vpop.permute.xlu0 %341 }
 0x372   :  { %2631 = vmatprep.subr.msk.mxu1 %vm343_vm4, %v342_v12 }
 0x373   :  { %2632 = vmatpush3.xpose.msk.msra.mxu1 %vm343_vm4, %v342_v12  ;;  %v340_v13 = vpop.permute.xlu1 %339 }
 0x374   :  { %2633 = vmatprep.subr.msk.mxu1 %vm343_vm4, %v340_v13 }
 0x377   :  { %2634 = vmatpush3.xpose.msk.msra.mxu1 %vm343_vm4, %v340_v13 }
 0x37a   :  { %2636 = vmatmul.mubr.msk.f32.vlgmr.msra.gmra.mxu1 %vm343_vm4, %v3209_v9 }
 0x43a   :  { %v2637_v14 = vpop.f32.mrf.mxu1 }
 0x43b   :  { %v428_v16 = vmul.f32 0.25, %v2637_v14  ;;  %v335_v14 = vld [vmem:[%s3645_s9 + $0x10] sm:$0xff] }
 0x43c   :  { %v418_v17 = vpop.f32.mrf.mxu1 }
 0x43d   :  { %v427_v19 = vmul.f32 0.25, %v418_v17  ;;  %v430_v20 = vadd.f32 %v428_v16, %v3228_v15  ;;  %v334_v16 = vld [vmem:[%s3645_s9 + $0x8] sm:$0xff] }
 0x43f   :  { %v436_v21 = vsel %vm435_vm5, %v430_v20, -inf  ;;  %v429_v22 = vadd.f32 %v427_v19, %v3233_v18 }
 0x440   :  { %437 = vmax.xlane.f32.xlu0 %v436_v21 }
 0x441   :  { %v432_v23 = vsel %vm431_vm6, %v429_v22, -inf }
 0x442   :  { %433 = vmax.xlane.f32.xlu1 %v432_v23 }
 0x4c9   :  { %v438_v24 = vpop.xlane.xlu0 %437 }
 0x4ca   :  { %v440_v25 = vsub.f32 %v430_v20, %v438_v24  ;;  %v333_v20 = vld [vmem:[%s3645_s9] sm:$0xff] }
 0x4cb   :  { %v434_v26 = vpop.xlane.xlu1 %433 }
 0x4cc   :  { %v443_v27 = vmul.f32 1.442695, %v440_v25  ;;  %v439_v28 = vsub.f32 %v429_v22, %v434_v26  ;;  %v2423_v25 = vld [vmem:[%s3646_s10] ss:$0 sm:$0xff] }
 0x4ce   :  { %2848 = vpow2.f32 %v443_v27  ;;  %v441_v29 = vmul.f32 1.442695, %v439_v28 }
 0x4d0   :  { %2850 = vpow2.f32 %v441_v29 }
 0x4db   :  { %v2849_v30 = vpop.eup %2848 }
 0x4dc   :  { %v448_v31 = vsel %vm435_vm5, %v2849_v30, 0.0 }
 0x4dd   :  { %v2851_v33 = vpop.eup %2850  ;;  %449 = vadd.xlane.f32.xlu1 %v448_v31 }
 0x4de   :  { %v445_v34 = vsel %vm431_vm6, %v2851_v33, 0.0 }
 0x4df   :  { %446 = vadd.xlane.f32.xlu0 %v445_v34 }
 0x4ee   :  { %455 = vrot.lane.b32.xlu1 %v3211_v11, %s2928_s26 }
 0x4f2   :  { %550 = vrot.lane.b32.xlu1 %v3209_v9, %s2929_s24 }
 0x4f5   :  { %457 = vrot.lane.b32.xlu0 %v3209_v9, %s2928_s26 }
 0x4f6   :  { %548 = vrot.lane.b32.xlu1 %v3211_v11, %s2929_s24 }
 0x4f9   :  { %544 = vrot.lane.b32.xlu0 %v3211_v11, %s2930_s6 }
 0x4fa   :  { %546 = vrot.lane.b32.xlu1 %v3209_v9, %s2930_s6 }
 0x566   :  { %v450_v35 = vpop.xlane.xlu1 %449 }
 0x567   :  { %2852 = vrcp.f32 %v450_v35 }
 0x568   :  { %v447_v36 = vpop.xlane.xlu0 %446 }
 0x569   :  { %2854 = vrcp.f32 %v447_v36 }
 0x56a   :  { %v456_v38 = vpop.permute.xlu1 %455 }
 0x56c   :  { %v458_v39 = vpop.permute.xlu0 %457 }
 0x56d   :  { %2638 = vmatprep.subr.msk.mxu1 %vm466_vm7, %v458_v39 }
 0x56e   :  { %2639 = vmatpush3.msk.msra.mxu1 %vm466_vm7, %v458_v39  ;;  %v551_v40 = vpop.permute.xlu1 %550 }
 0x56f   :  { %2640 = vmatprep.subr.mxu1 %v456_v38 }
 0x570   :  { %2641 = vmatpush3.msra.mxu1 %v456_v38  ;;  %v545_v45 = vpop.permute.xlu0 %544 }
 0x571   :  { %2645 = vmatprep.subr.msk.mxu1 %vm343_vm4, %v551_v40 }
 0x572   :  { %v549_v46 = vpop.permute.xlu1 %548 }
 0x574   :  { %v2853_v41 = vpop.eup %2852 }
 0x575   :  { %v454_v44 = vmul.f32 %v2853_v41, %v2849_v30 }
 0x576   :  { %v2855_v42 = vpop.eup %2854  ;;  %v547_v47 = vpop.permute.xlu1 %546 }
 0x577   :  { %v452_v43 = vmul.f32 %v2855_v42, %v2851_v33 }
 0x579   :  { %2642 = vmatprep.mubr.msk.f32.mxu1 %vm431_vm6, %v452_v43 }
 0x57a   :  { %2643 = vmatmul.mubr.msk.f32.vlgmr.msra.gmra.mxu1 %vm431_vm6, %v454_v44  ;;  %v969_v44 = vld [vmem:[%s3649_s13 + $0x18] sm:$0xff] }
 0x57b   :  { %2646 = vmatpush3.xpose.msk.msra.mxu1 %vm343_vm4, %v551_v40  ;;  %2649 = vmatprep.mubr.msk.f32.mxu1 %vm343_vm4, %v545_v45  ;;  %v968_v45 = vld [vmem:[%s3649_s13 + $0x10] sm:$0xff] }
 0x57c   :  { %2647 = vmatprep.subr.msk.mxu1 %vm343_vm4, %v549_v46 }
 0x57f   :  { %2648 = vmatpush3.xpose.msk.msra.mxu1 %vm343_vm4, %v549_v46  ;;  %v967_v46 = vld [vmem:[%s3649_s13 + $0x8] sm:$0xff] }
 0x582   :  { %2650 = vmatmul.mubr.msk.f32.vlgmr.msra.gmra.mxu1 %vm343_vm4, %v547_v47  ;;  %v966_v47 = vld [vmem:[%s3649_s13] sm:$0xff] }
 0x63a   :  { %v2644_v48 = vpop.f32.mrf.mxu1 }
 0x63c   :  { %v535_v49 = vpop.f32.mrf.mxu1 }
 0x642   :  { %v2651_v50 = vpop.f32.mrf.mxu1 }
 0x643   :  { %v636_v51 = vmul.f32 0.25, %v2651_v50 }
 0x644   :  { %v626_v52 = vpop.f32.mrf.mxu1 }
 0x645   :  { %v635_v53 = vmul.f32 0.25, %v626_v52  ;;  %v638_v54 = vadd.f32 %v636_v51, %v3228_v15 }
 0x647   :  { %v642_v55 = vsel %vm435_vm5, %v638_v54, -inf  ;;  %v637_v56 = vadd.f32 %v635_v53, %v3233_v18 }
 0x648   :  { %643 = vmax.xlane.f32.xlu1 %v642_v55  ;;  %v2424_v55 = vld [vmem:[%s3647_s11] ss:$0 sm:$0xff] }
 0x649   :  { %v639_v57 = vsel %vm431_vm6, %v637_v56, -inf }
 0x64a   :  { %640 = vmax.xlane.f32.xlu0 %v639_v57 }
 0x659   :  { %661 = vrot.lane.b32.xlu1 %v3211_v11, %s3667_s27 }
 0x6d1   :  { %v644_v58 = vpop.xlane.xlu1 %643 }
 0x6d2   :  { %v646_v59 = vsub.f32 %v638_v54, %v644_v58 }
 0x6d3   :  { %v641_v60 = vpop.xlane.xlu0 %640 }
 0x6d4   :  { %v649_v61 = vmul.f32 1.442695, %v646_v59  ;;  %v645_v62 = vsub.f32 %v637_v56, %v641_v60  ;;  %v2425_v60 = vld [vmem:[%s3648_s12] ss:$0 sm:$0xff] }
 0x6d5   :  { %v662_v8 = vpop.permute.xlu1 %661 }
 0x6d6   :  { %2856 = vpow2.f32 %v649_v61  ;;  %v647_v63 = vmul.f32 1.442695, %v645_v62 }
 0x6d8   :  { %2858 = vpow2.f32 %v647_v63 }
 0x6e3   :  { %v2857_v0 = vpop.eup %2856 }
 0x6e4   :  { %v654_v2 = vsel %vm435_vm5, %v2857_v0, 0.0 }
 0x6e5   :  { %v2859_v3 = vpop.eup %2858  ;;  %655 = vadd.xlane.f32.xlu0 %v654_v2  ;;  %v1090_v2 = vld [vmem:[%s3651_s15 + $0x70] sm:$0xff] }
 0x6e6   :  { %v651_v4 = vsel %vm431_vm6, %v2859_v3, 0.0 }
 0x6e9   :  { %652 = vadd.xlane.f32.xlu0 %v651_v4  ;;  %v1088_v4 = vld [vmem:[%s3651_s15 + $0x60] sm:$0xff] }
 0x6ff   :  { %663 = vrot.lane.b32.xlu0 %v3209_v9, %s3667_s27  ;;  %v336_v9 = vld [vmem:[%s3645_s9 + $0x18] sm:$0xff] }
 0x76e   :  { %v656_v5 = vpop.xlane.xlu0 %655 }
 0x76f   :  { %2860 = vrcp.f32 %v656_v5  ;;  %v1087_v5 = vld [vmem:[%s3651_s15 + $0x58] sm:$0xff] }
 0x772   :  { %v653_v6 = vpop.xlane.xlu0 %652 }
 0x773   :  { %2862 = vrcp.f32 %v653_v6  ;;  %v1086_v6 = vld [vmem:[%s3651_s15 + $0x50] sm:$0xff] }
 0x776   :  { %v664_v7 = vpop.permute.xlu0 %663 }
 0x777   :  { %2652 = vmatprep.subr.msk.mxu1 %vm466_vm7, %v664_v7 }
 0x778   :  { %2653 = vmatpush3.msk.msra.mxu1 %vm466_vm7, %v664_v7  ;;  %v1085_v7 = vld [vmem:[%s3651_s15 + $0x48] sm:$0xff] }
 0x779   :  { %2654 = vmatprep.subr.mxu1 %v662_v8 }
 0x77a   :  { %2655 = vmatpush3.msra.mxu1 %v662_v8  ;;  %v1084_v8 = vld [vmem:[%s3651_s15 + $0x40] sm:$0xff] }
 0x77b   :  { %2659 = vmatprep.subr.mxu1 %v336_v9 }
 0x77c   :  { %v2861_v10 = vpop.eup %2860 }
 0x77d   :  { %v660_v13 = vmul.f32 %v2861_v10, %v2857_v0  ;;  %v1091_v0 = vld [vmem:[%s3651_s15 + $0x78] sm:$0xff] }
 0x77e   :  { %v1083_v10 = vld [vmem:[%s3651_s15 + $0x38] sm:$0xff] }
 0x780   :  { %v2863_v11 = vpop.eup %2862 }
 0x781   :  { %v658_v12 = vmul.f32 %v2863_v11, %v2859_v3  ;;  %v1089_v3 = vld [vmem:[%s3651_s15 + $0x68] sm:$0xff]  ;;  %v1082_v11 = vld [vmem:[%s3651_s15 + $0x30] sm:$0xff] }
 0x783   :  { %2656 = vmatprep.mubr.msk.f32.mxu1 %vm431_vm6, %v658_v12  ;;  %v1081_v12 = vld [vmem:[%s3651_s15 + $0x28] sm:$0xff] }
 0x784   :  { %2657 = vmatmul.mubr.msk.f32.vlgmr.msra.gmra.mxu1 %vm431_vm6, %v660_v13  ;;  %v1080_v13 = vld [vmem:[%s3651_s15 + $0x20] sm:$0xff] }
 0x785   :  { %2660 = vmatpush3.msra.mxu1 %v336_v9  ;;  %v1079_v9 = vld [vmem:[%s3651_s15 + $0x18] sm:$0xff] }
 0x786   :  { %2661 = vmatprep.subr.mxu1 %v335_v14 }
 0x787   :  { %2662 = vmatpush3.msra.mxu1 %v335_v14  ;;  %v1078_v14 = vld [vmem:[%s3651_s15 + $0x10] sm:$0xff] }
 0x788   :  { %2666 = vmatprep.subr.mxu1 %v334_v16 }
 0x844   :  { %v2658_v17 = vpop.f32.mrf.mxu1 }
 0x846   :  { %v740_v19 = vpop.f32.mrf.mxu1 }
 0x847   :  { %2663 = vmatprep.mubr.msk.f32.mxu1 %vm343_vm4, %v740_v19  ;;  %v2426_v19 = vld [vmem:[%s3650_s14] ss:$0 sm:$0xff] }
 0x848   :  { %2664 = vmatmul.mubr.msk.f32.vlgmr.msra.gmra.mxu1 %vm343_vm4, %v2658_v17  ;;  %v1076_v17 = vld [vmem:[%s3651_s15] sm:$0xff] }
 0x849   :  { %2667 = vmatpush3.msra.mxu1 %v334_v16  ;;  %2670 = vmatprep.mubr.msk.f32.mxu1 %vm343_vm4, %v535_v49  ;;  %v1077_v16 = vld [vmem:[%s3651_s15 + $0x8] sm:$0xff] }
 0x84a   :  { %2668 = vmatprep.subr.mxu1 %v333_v20 }
 0x84b   :  { %2669 = vmatpush3.msra.mxu1 %v333_v20 }
 0x84c   :  { %2671 = vmatmul.mubr.msk.f32.vlgmr.msra.gmra.mxu1 %vm343_vm4, %v2644_v48  ;;  %2673 = vmatprep.subr.mxu1 %v969_v44 }
 0x84d   :  { %2674 = vmatpush3.msra.mxu1 %v969_v44  ;;  %v2429_v44 = vld [vmem:[%s3652_s16] ss:$0 sm:$0xff] }
 0x84e   :  { %2675 = vmatprep.subr.mxu1 %v968_v45 }
 0x84f   :  { %2676 = vmatpush3.msra.mxu1 %v968_v45 }
 0x850   :  { %2677 = vmatprep.subr.mxu1 %v967_v46 }
 0x851   :  { %2678 = vmatpush3.msra.mxu1 %v967_v46 }
 0x852   :  { %2679 = vmatprep.subr.mxu1 %v966_v47 }
 0x853   :  { %2680 = vmatpush3.msra.mxu1 %v966_v47 }
 0x854   :  { %2684 = vmatprep.subr.mxu1 %v1091_v0 }
 0x908   :  { %v2665_v21 = vpop.f32.mrf.mxu1 }
 0x90a   :  { %v821_v22 = vpop.f32.mrf.mxu1 }
 0x90c   :  { %v2672_v23 = vpop.f32.mrf.mxu1 }
 0x90d   :  { %v908_v24 = vadd.f32 %v2672_v23, %v2665_v21 }
 0x90e   :  { %v902_v26 = vpop.f32.mrf.mxu1 }
 0x90f   :  { %v912_v27 = vadd.f32 %v908_v24, %v3178_v37  ;;  %v903_v28 = vadd.f32 %v902_v26, %v821_v22 }
 0x911   :  { %v3297_v29 = vadd.f32 %v2423_v25, %v912_v27  ;;  %v911_v30 = vadd.f32 %v903_v28, %v3171_v32 }
 0x913   :  { %v3300_v31 = vadd.f32 %v2423_v25, %v911_v30  ;;  %v927_v33 = vsel %vm200_vm3, %v3297_v29, 0.0 }
 0x914   :  { %928 = vadd.xlane.f32.xlu0 %v927_v33 }
 0x915   :  { %v924_v34 = vsel %vm196_vm2, %v3300_v31, 0.0 }
 0x916   :  { %925 = vadd.xlane.f32.xlu1 %v924_v34 }
 0x99d   :  { %v929_v35 = vpop.xlane.xlu0 %928 }
 0x99e   :  { %v931_v36 = vmul.f32 0.03125, %v929_v35 }
 0x99f   :  { %v926_v38 = vpop.xlane.xlu1 %925 }
 0x9a0   :  { %v933_v37 = vsub.f32 %v3297_v29, %v931_v36  ;;  %v930_v39 = vmul.f32 0.03125, %v926_v38 }
 0x9a2   :  { %v932_v40 = vsub.f32 %v3300_v31, %v930_v39  ;;  %v935_v41 = vmul.f32 %v933_v37, %v933_v37 }
 0x9a4   :  { %v939_v32 = vsel %vm200_vm3, %v935_v41, 0.0  ;;  %v934_v42 = vmul.f32 %v932_v40, %v932_v40 }
 0x9a5   :  { %940 = vadd.xlane.f32.xlu1 %v939_v32 }
 0x9a6   :  { %v936_v43 = vsel %vm196_vm2, %v934_v42, 0.0 }
 0x9a7   :  { %937 = vadd.xlane.f32.xlu0 %v936_v43 }
 0xa2e   :  { %v941_v48 = vpop.xlane.xlu1 %940 }
 0xa2f   :  { %v943_v49 = vmul.f32 0.03125, %v941_v48 }
 0xa30   :  { %v938_v50 = vpop.xlane.xlu0 %937 }
 0xa31   :  { %v945_v51 = vadd.f32 1e-06, %v943_v49  ;;  %v942_v52 = vmul.f32 0.03125, %v938_v50 }
 0xa33   :  { %2864 = vrsqrt.f32 %v945_v51  ;;  %v944_v53 = vadd.f32 1e-06, %v942_v52 }
 0xa35   :  { %2866 = vrsqrt.f32 %v944_v53 }
 0xa40   :  { %v2865_v54 = vpop.eup %2864 }
 0xa41   :  { %v949_v56 = vmul.f32 %v2865_v54, %v933_v37 }
 0xa42   :  { %v2867_v57 = vpop.eup %2866 }
 0xa43   :  { %v948_v58 = vmul.f32 %v2867_v57, %v932_v40  ;;  %v957_v59 = vmul.f32 %v2424_v55, %v949_v56 }
 0xa45   :  { %v956_v61 = vmul.f32 %v2424_v55, %v948_v58  ;;  %v965_v63 = vadd.f32 %v2425_v60, %v957_v59 }
 0xa47   :  { %v964_v62 = vadd.f32 %v2425_v60, %v956_v61  ;;  %v2437_v61 = vld [vmem:[%s3680_s29 + $0x38] sm:$0xff] }
 0xa49   :  { %2681 = vmatprep.mubr.msk.f32.mxu1 %vm196_vm2, %v964_v62  ;;  %v2436_v62 = vld [vmem:[%s3680_s29 + $0x30] sm:$0xff] }
 0xa4a   :  { %2682 = vmatmul.mubr.msk.f32.vlgmr.msra.gmra.mxu1 %vm196_vm2, %v965_v63  ;;  %v2435_v63 = vld [vmem:[%s3680_s29 + $0x28] sm:$0xff] }
 0xa4b   :  { %2685 = vmatpush3.msra.mxu1 %v1091_v0  ;;  %v2434_v0 = vld [vmem:[%s3680_s29 + $0x20] sm:$0xff] }
 0xa4c   :  { %2686 = vmatprep.subr.mxu1 %v1090_v2 }
 0xa4d   :  { %2687 = vmatpush3.msra.mxu1 %v1090_v2 }
 0xa4e   :  { %2688 = vmatprep.subr.mxu1 %v1089_v3 }
 0xa4f   :  { %2689 = vmatpush3.msra.mxu1 %v1089_v3 }
 0xa50   :  { %2690 = vmatprep.subr.mxu1 %v1088_v4 }
 0xa51   :  { %2691 = vmatpush3.msra.mxu1 %v1088_v4 }
 0xa52   :  { %2692 = vmatprep.subr.mxu1 %v1087_v5 }
 0xa53   :  { %2693 = vmatpush3.msra.mxu1 %v1087_v5 }
 0xa54   :  { %2694 = vmatprep.subr.mxu1 %v1086_v6 }
 0xa55   :  { %2695 = vmatpush3.msra.mxu1 %v1086_v6 }
 0xa56   :  { %2696 = vmatprep.subr.mxu1 %v1085_v7 }
 0xa57   :  { %2697 = vmatpush3.msra.mxu1 %v1085_v7 }
 0xa58   :  { %2698 = vmatprep.subr.mxu1 %v1084_v8 }
 0xa59   :  { %2699 = vmatpush3.msra.mxu1 %v1084_v8 }
 0xa5a   :  { %2700 = vmatprep.subr.mxu1 %v1083_v10 }
 0xa5b   :  { %2701 = vmatpush3.msra.mxu1 %v1083_v10  ;;  %v2432_v10 = vld [vmem:[%s3681_s2 + $0x1] ss:$0 sm:$0xff] }
 0xa5c   :  { %2702 = vmatprep.subr.mxu1 %v1082_v11 }
 0xa5d   :  { %2703 = vmatpush3.msra.mxu1 %v1082_v11 }
 0xa5e   :  { %2704 = vmatprep.subr.mxu1 %v1081_v12 }
 0xa5f   :  { %2705 = vmatpush3.msra.mxu1 %v1081_v12 }
 0xa60   :  { %2706 = vmatprep.subr.mxu1 %v1080_v13 }
 0xa61   :  { %2707 = vmatpush3.msra.mxu1 %v1080_v13 }
 0xa62   :  { %2708 = vmatprep.subr.mxu1 %v1079_v9 }
 0xa63   :  { %2709 = vmatpush3.msra.mxu1 %v1079_v9 }
 0xa64   :  { %2710 = vmatprep.subr.mxu1 %v1078_v14 }
 0xa65   :  { %2711 = vmatpush3.msra.mxu1 %v1078_v14  ;;  %v2433_v14 = vld [vmem:[%s3682_s7 + $0x1] ss:$0 sm:$0xff] }
 0xa66   :  { %2712 = vmatprep.subr.mxu1 %v1077_v16 }
 0xa67   :  { %2713 = vmatpush3.msra.mxu1 %v1077_v16 }
 0xa68   :  { %2714 = vmatprep.subr.mxu1 %v1076_v17 }
 0xa69   :  { %2715 = vmatpush3.msra.mxu1 %v1076_v17 }
 0xa6a   :  { %2719 = vmatprep.subr.mxu1 %v2437_v61 }
 0xb0a   :  { %v2683_v20 = vpop.f32.mrf.mxu1 }
 0xb0b   :  { %v1055_v21 = vadd.f32 %v2683_v20, %v2426_v19  ;;  %v2439_v20 = vld [vmem:[%s3644_s8 + $0x1] ss:$0 sm:$0xff]  ;;  %s3684_s8 = smov 48  }
 0xb0c   :  { %v1049_v22 = vpop.f32.mrf.mxu1 }
 0xb0d   :  { %v1061_v23 = vmul.f32 0.044715, %v1055_v21  ;;  %v1050_v24 = vadd.f32 %v2426_v19, %v1049_v22  ;;  %v1059_v32 = vmul.f32 0.5, %v1055_v21 }
 0xb0f   :  { %v1063_v25 = vmul.f32 %v1061_v23, %v1055_v21  ;;  %v1060_v26 = vmul.f32 0.044715, %v1050_v24  ;;  %v1058_v40 = vmul.f32 0.5, %v1050_v24 }
 0xb11   :  { %v1065_v27 = vmul.f32 %v1063_v25, %v1055_v21  ;;  %v1062_v28 = vmul.f32 %v1060_v26, %v1050_v24 }
 0xb13   :  { %v1067_v30 = vadd.f32 %v1065_v27, %v1055_v21  ;;  %v1064_v33 = vmul.f32 %v1062_v28, %v1050_v24 }
 0xb15   :  { %v1066_v34 = vadd.f32 %v1064_v33, %v1050_v24  ;;  %v1069_v35 = vmul.f32 0.7978846, %v1067_v30 }
 0xb17   :  { %v1068_v36 = vmul.f32 0.7978846, %v1066_v34  ;;  %2868 = vtanh.f32 %v1069_v35 }
 0xb19   :  { %2870 = vtanh.f32 %v1068_v36 }
 0xb24   :  { %v2869_v38 = vpop.eup %2868 }
 0xb25   :  { %v1073_v39 = vadd.f32 1.0, %v2869_v38 }
 0xb26   :  { %v2871_v37 = vpop.eup %2870 }
 0xb27   :  { %v1072_v41 = vadd.f32 1.0, %v2871_v37  ;;  %v1075_v43 = vmul.f32 %v1073_v39, %v1059_v32 }
 0xb29   :  { %v1074_v42 = vmul.f32 %v1072_v41, %v1058_v40 }
 0xb2b   :  { %2716 = vmatprep.mubr.f32.mxu1 %v1074_v42 }
 0xb2c   :  { %2717 = vmatmul.mubr.f32.vlgmr.msra.gmra.mxu1 %v1075_v43 }
 0xb2d   :  { %2720 = vmatpush3.msra.mxu1 %v2437_v61 }
 0xb2e   :  { %2721 = vmatprep.subr.mxu1 %v2436_v62 }
 0xb2f   :  { %2722 = vmatpush3.msra.mxu1 %v2436_v62 }
 0xb30   :  { %2723 = vmatprep.subr.mxu1 %v2435_v63 }
 0xb31   :  { %2724 = vmatpush3.msra.mxu1 %v2435_v63 }
 0xb32   :  { %2725 = vmatprep.subr.mxu1 %v2434_v0 }
 0xb33   :  { %2726 = vmatpush3.msra.mxu1 %v2434_v0 }
 0xbec   :  { %v2718_v45 = vpop.f32.mrf.mxu1 }
 0xbed   :  { %v1171_v46 = vadd.f32 %v2718_v45, %v2429_v44 }
 0xbee   :  { %v1165_v47 = vpop.f32.mrf.mxu1 }
 0xbef   :  { %v3385_v48 = vadd.f32 %v1171_v46, %v3297_v29  ;;  %v1166_v49 = vadd.f32 %v2429_v44, %v1165_v47 }
 0xbf1   :  { %v3388_v50 = vadd.f32 %v1166_v49, %v3300_v31  ;;  %v1183_v51 = vsel %vm200_vm3, %v3385_v48, 0.0 }
 0xbf2   :  { %1184 = vadd.xlane.f32.xlu1 %v1183_v51 }
 0xbf3   :  { %v1180_v52 = vsel %vm196_vm2, %v3388_v50, 0.0 }
 0xbf4   :  { %1181 = vadd.xlane.f32.xlu0 %v1180_v52 }
 0xc7b   :  { %v1185_v53 = vpop.xlane.xlu1 %1184 }
 0xc7c   :  { %v1187_v54 = vmul.f32 0.03125, %v1185_v53 }
 0xc7d   :  { %v1182_v55 = vpop.xlane.xlu0 %1181 }
 0xc7e   :  { %v1189_v56 = vsub.f32 %v3385_v48, %v1187_v54  ;;  %v1186_v57 = vmul.f32 0.03125, %v1182_v55 }
 0xc80   :  { %v1188_v29 = vsub.f32 %v3388_v50, %v1186_v57  ;;  %v1191_v58 = vmul.f32 %v1189_v56, %v1189_v56 }
 0xc82   :  { %v1195_v31 = vsel %vm200_vm3, %v1191_v58, 0.0  ;;  %v1190_v59 = vmul.f32 %v1188_v29, %v1188_v29 }
 0xc83   :  { %1196 = vadd.xlane.f32.xlu1 %v1195_v31 }
 0xc84   :  { %v1192_v60 = vsel %vm196_vm2, %v1190_v59, 0.0 }
 0xc85   :  { %1193 = vadd.xlane.f32.xlu0 %v1192_v60 }
 0xd0c   :  { %v1197_v2 = vpop.xlane.xlu1 %1196 }
 0xd0d   :  { %v1199_v3 = vmul.f32 0.03125, %v1197_v2 }
 0xd0e   :  { %v1194_v4 = vpop.xlane.xlu0 %1193 }
 0xd0f   :  { %v1201_v5 = vadd.f32 1e-06, %v1199_v3  ;;  %v1198_v6 = vmul.f32 0.03125, %v1194_v4 }
 0xd11   :  { %2872 = vrsqrt.f32 %v1201_v5  ;;  %v1200_v7 = vadd.f32 1e-06, %v1198_v6 }
 0xd13   :  { %2874 = vrsqrt.f32 %v1200_v7 }
 0xd1e   :  { %v2873_v8 = vpop.eup %2872 }
 0xd1f   :  { %v1205_v11 = vmul.f32 %v2873_v8, %v1189_v56 }
 0xd20   :  { %v2875_v12 = vpop.eup %2874 }
 0xd21   :  { %v1204_v13 = vmul.f32 %v2875_v12, %v1188_v29  ;;  %v1213_v9 = vmul.f32 %v2432_v10, %v1205_v11 }
 0xd23   :  { %v1212_v16 = vmul.f32 %v2432_v10, %v1204_v13  ;;  %v1221_v19 = vadd.f32 %v2433_v14, %v1213_v9 }
 0xd25   :  { %v1220_v17 = vadd.f32 %v2433_v14, %v1212_v16 }
 0xd27   :  { %2727 = vmatprep.mubr.msk.f32.mxu1 %vm196_vm2, %v1220_v17 }
 0xd28   :  { %2728 = vmatmul.mubr.msk.f32.vlgmr.msra.gmra.mxu1 %vm196_vm2, %v1221_v19 }
 0xde8   :  { %v2729_v21 = vpop.f32.mrf.mxu1 }
 0xde9   :  { %v3421_v22 = vadd.f32 %v2729_v21, %v2439_v20 }
 0xdea   :  { %v1307_v23 = vpop.f32.mrf.mxu1 }
 0xdeb   :  { %v3423_v24 = vadd.f32 %v2439_v20, %v1307_v23  ;;  %1325 = vrot.lane.b32.xlu0 %v3421_v22, %s2927_s0  ;;  %v2443_v20 = vld [vmem:[%s3645_s9 + $0x28] sm:$0xff] }
 0xded   :  { %1323 = vrot.lane.b32.xlu1 %v3423_v24, %s2927_s0  ;;  %2734 = vmatprep.mubr.msk.f32.mxu0 %vm343_vm4, %v3423_v24 }
 0xe5d   :  { %v1326_v25 = vpop.permute.xlu0 %1325 }
 0xe5e   :  { %2730 = vmatprep.subr.msk.mxu0 %vm343_vm4, %v1326_v25 }
 0xe5f   :  { %2731 = vmatpush3.xpose.msk.msra.mxu0 %vm343_vm4, %v1326_v25  ;;  %v1324_v26 = vpop.permute.xlu1 %1323  ;;  %v2442_v25 = vld [vmem:[%s3645_s9 + $0x20] sm:$0xff] }
 0xe60   :  { %2732 = vmatprep.subr.msk.mxu0 %vm343_vm4, %v1324_v26 }
 0xe63   :  { %2733 = vmatpush3.xpose.msk.msra.mxu0 %vm343_vm4, %v1324_v26  ;;  %v2445_v26 = vld [vmem:[%s3645_s9 + $0x38] sm:$0xff] }
 0xe64   :  { %2758 = vmatprep.subr.mxu1 %v2445_v26 }
 0xe65   :  { %2759 = vmatpush3.msra.mxu1 %v2445_v26  ;;  %v2475_v26 = vld [vmem:[%s3650_s14 + $0x1] ss:$0 sm:$0xff] }
 0xe66   :  { %2735 = vmatmul.mubr.msk.f32.vlgmr.msra.gmra.mxu0 %vm343_vm4, %v3421_v22 }
 0xf26   :  { %v2736_v27 = vpop.f32.mrf.mxu0 }
 0xf27   :  { %v1411_v28 = vmul.f32 0.25, %v2736_v27  ;;  %v2444_v27 = vld [vmem:[%s3645_s9 + $0x30] sm:$0xff]  ;;  %s2933_s9 = smov [#allocation2]  }
 0xf28   :  { %v1401_v30 = vpop.f32.mrf.mxu0  ;;  %2760 = vmatprep.subr.mxu1 %v2444_v27 }
 0xf29   :  { %v1410_v33 = vmul.f32 0.25, %v1401_v30  ;;  %v1413_v34 = vadd.f32 %v1411_v28, %v3228_v15  ;;  %2761 = vmatpush3.msra.mxu1 %v2444_v27 }
 0xf2b   :  { %v1417_v35 = vsel %vm435_vm5, %v1413_v34, -inf  ;;  %v1412_v36 = vadd.f32 %v1410_v33, %v3233_v18 }
 0xf2c   :  { %1418 = vmax.xlane.f32.xlu0 %v1417_v35 }
 0xf2d   :  { %v1414_v38 = vsel %vm431_vm6, %v1412_v36, -inf }
 0xf2e   :  { %1415 = vmax.xlane.f32.xlu1 %v1414_v38  ;;  %v2465_v38 = vld [vmem:[%s3646_s10 + $0x1] ss:$0 sm:$0xff]  ;;  %s2389_s10 = sshll.u32 %s2933_s9, 4  ;;  %s2390_s10 = int_to_ptr.vmem [resolvable:$true] %s2389_s10 }
 0xf2f   :  { %p2909_p1 = scmp.lt.s32.totalorder %s2390_s10, %s2390_s10 }
 0xfb5   :  { %v1419_v37 = vpop.xlane.xlu0 %1418 }
 0xfb6   :  { %v1421_v39 = vsub.f32 %v1413_v34, %v1419_v37 }
 0xfb7   :  { %v1416_v40 = vpop.xlane.xlu1 %1415 }
 0xfb8   :  { %v1424_v41 = vmul.f32 1.442695, %v1421_v39  ;;  %v1420_v32 = vsub.f32 %v1412_v36, %v1416_v40 }
 0xfba   :  { %2876 = vpow2.f32 %v1424_v41  ;;  %v1422_v42 = vmul.f32 1.442695, %v1420_v32 }
 0xfbc   :  { %2878 = vpow2.f32 %v1422_v42 }
 0xfc7   :  { %v2877_v43 = vpop.eup %2876 }
 0xfc8   :  { %v1429_v44 = vsel %vm435_vm5, %v2877_v43, 0.0 }
 0xfc9   :  { %v2879_v45 = vpop.eup %2878  ;;  %1430 = vadd.xlane.f32.xlu1 %v1429_v44 }
 0xfca   :  { %v1426_v46 = vsel %vm431_vm6, %v2879_v45, 0.0 }
 0xfcb   :  { %1427 = vadd.xlane.f32.xlu0 %v1426_v46 }
 0xfda   :  { %1436 = vrot.lane.b32.xlu1 %v3423_v24, %s2928_s26 }
 0xfde   :  { %1530 = vrot.lane.b32.xlu1 %v3421_v22, %s2929_s24 }
 0xfe1   :  { %1438 = vrot.lane.b32.xlu0 %v3421_v22, %s2928_s26 }
 0xfe2   :  { %1528 = vrot.lane.b32.xlu1 %v3423_v24, %s2929_s24 }
 0xfe5   :  { %1524 = vrot.lane.b32.xlu0 %v3423_v24, %s2930_s6 }
 0xfe6   :  { %1526 = vrot.lane.b32.xlu1 %v3421_v22, %s2930_s6 }
0x1052   :  { %v1431_v47 = vpop.xlane.xlu1 %1430 }
0x1053   :  { %2880 = vrcp.f32 %v1431_v47 }
0x1054   :  { %v1428_v49 = vpop.xlane.xlu0 %1427 }
0x1055   :  { %2882 = vrcp.f32 %v1428_v49 }
0x1056   :  { %v1437_v51 = vpop.permute.xlu1 %1436 }
0x1058   :  { %v1439_v52 = vpop.permute.xlu0 %1438 }
0x1059   :  { %2737 = vmatprep.subr.msk.mxu0 %vm466_vm7, %v1439_v52 }
0x105a   :  { %2738 = vmatpush3.msk.msra.mxu0 %vm466_vm7, %v1439_v52  ;;  %v1531_v53 = vpop.permute.xlu1 %1530 }
0x105b   :  { %2739 = vmatprep.subr.mxu0 %v1437_v51 }
0x105c   :  { %2740 = vmatpush3.msra.mxu0 %v1437_v51  ;;  %v1525_v29 = vpop.permute.xlu0 %1524 }
0x105d   :  { %2744 = vmatprep.subr.msk.mxu0 %vm343_vm4, %v1531_v53 }
0x105e   :  { %v1529_v58 = vpop.permute.xlu1 %1528 }
0x1060   :  { %v2881_v54 = vpop.eup %2880 }
0x1061   :  { %v1435_v57 = vmul.f32 %v2881_v54, %v2877_v43 }
0x1062   :  { %v2883_v55 = vpop.eup %2882  ;;  %v1527_v31 = vpop.permute.xlu1 %1526 }
0x1063   :  { %v1433_v56 = vmul.f32 %v2883_v55, %v2879_v45  ;;  %v2473_v55 = vld [vmem:[%s3649_s13 + $0x38] sm:$0xff] }
0x1064   :  { %2772 = vmatprep.subr.mxu1 %v2473_v55 }
0x1065   :  { %2741 = vmatprep.mubr.msk.f32.mxu0 %vm431_vm6, %v1433_v56  ;;  %v2472_v56 = vld [vmem:[%s3649_s13 + $0x30] sm:$0xff] }
0x1066   :  { %2742 = vmatmul.mubr.msk.f32.vlgmr.msra.gmra.mxu0 %vm431_vm6, %v1435_v57  ;;  %v2471_v57 = vld [vmem:[%s3649_s13 + $0x28] sm:$0xff] }
0x1067   :  { %2745 = vmatpush3.xpose.msk.msra.mxu0 %vm343_vm4, %v1531_v53  ;;  %2748 = vmatprep.mubr.msk.f32.mxu0 %vm343_vm4, %v1525_v29  ;;  %v2470_v29 = vld [vmem:[%s3649_s13 + $0x20] sm:$0xff] }
0x1068   :  { %2746 = vmatprep.subr.msk.mxu0 %vm343_vm4, %v1529_v58 }
0x106b   :  { %2747 = vmatpush3.xpose.msk.msra.mxu0 %vm343_vm4, %v1529_v58 }
0x106e   :  { %2749 = vmatmul.mubr.msk.f32.vlgmr.msra.gmra.mxu0 %vm343_vm4, %v1527_v31 }
0x1126   :  { %v2743_v59 = vpop.f32.mrf.mxu0 }
0x1128   :  { %v1515_v60 = vpop.f32.mrf.mxu0 }
0x112e   :  { %v2750_v61 = vpop.f32.mrf.mxu0 }
0x112f   :  { %v1616_v62 = vmul.f32 0.25, %v2750_v61 }
0x1130   :  { %v1606_v63 = vpop.f32.mrf.mxu0 }
0x1131   :  { %v1615_v0 = vmul.f32 0.25, %v1606_v63  ;;  %v1618_v2 = vadd.f32 %v1616_v62, %v3228_v15 }
0x1133   :  { %v1622_v3 = vsel %vm435_vm5, %v1618_v2, -inf  ;;  %v1617_v4 = vadd.f32 %v1615_v0, %v3233_v18  ;;  %v2468_v0 = vld [vmem:[%s3647_s11 + $0x1] ss:$0 sm:$0xff] }
0x1134   :  { %1623 = vmax.xlane.f32.xlu1 %v1622_v3 }
0x1135   :  { %v1619_v5 = vsel %vm431_vm6, %v1617_v4, -inf }
0x1136   :  { %1620 = vmax.xlane.f32.xlu0 %v1619_v5 }
0x1145   :  { %1641 = vrot.lane.b32.xlu1 %v3423_v24, %s3684_s8 }
0x11bd   :  { %v1624_v6 = vpop.xlane.xlu1 %1623 }
0x11be   :  { %v1626_v7 = vsub.f32 %v1618_v2, %v1624_v6  ;;  %v2469_v6 = vld [vmem:[%s3648_s12 + $0x1] ss:$0 sm:$0xff] }
0x11bf   :  { %v1621_v8 = vpop.xlane.xlu0 %1620 }
0x11c0   :  { %v1629_v10 = vmul.f32 1.442695, %v1626_v7  ;;  %v1625_v11 = vsub.f32 %v1617_v4, %v1621_v8 }
0x11c1   :  { %v1642_v19 = vpop.permute.xlu1 %1641 }
0x11c2   :  { %2884 = vpow2.f32 %v1629_v10  ;;  %v1627_v12 = vmul.f32 1.442695, %v1625_v11  ;;  %v2493_v11 = vld [vmem:[%s3651_s15 + $0xf8] sm:$0xff] }
0x11c4   :  { %2886 = vpow2.f32 %v1627_v12  ;;  %v2492_v12 = vld [vmem:[%s3651_s15 + $0xf0] sm:$0xff] }
0x11cf   :  { %v2885_v15 = vpop.eup %2884 }
0x11d0   :  { %v1634_v13 = vsel %vm435_vm5, %v2885_v15, 0.0 }
0x11d1   :  { %v2887_v9 = vpop.eup %2886  ;;  %1635 = vadd.xlane.f32.xlu0 %v1634_v13  ;;  %v2490_v13 = vld [vmem:[%s3651_s15 + $0xe0] sm:$0xff] }
0x11d2   :  { %v1631_v18 = vsel %vm431_vm6, %v2887_v9, 0.0 }
0x11d5   :  { %1632 = vadd.xlane.f32.xlu0 %v1631_v18  ;;  %v2488_v18 = vld [vmem:[%s3651_s15 + $0xd0] sm:$0xff] }
0x11eb   :  { %1643 = vrot.lane.b32.xlu0 %v3421_v22, %s3684_s8 }
0x125a   :  { %v1636_v14 = vpop.xlane.xlu0 %1635 }
0x125b   :  { %2888 = vrcp.f32 %v1636_v14  ;;  %v2487_v14 = vld [vmem:[%s3651_s15 + $0xc8] sm:$0xff] }
0x125e   :  { %v1633_v16 = vpop.xlane.xlu0 %1632 }
0x125f   :  { %2890 = vrcp.f32 %v1633_v16  ;;  %v2486_v16 = vld [vmem:[%s3651_s15 + $0xc0] sm:$0xff] }
0x1262   :  { %v1644_v17 = vpop.permute.xlu0 %1643 }
0x1263   :  { %2751 = vmatprep.subr.msk.mxu0 %vm466_vm7, %v1644_v17 }
0x1264   :  { %2752 = vmatpush3.msk.msra.mxu0 %vm466_vm7, %v1644_v17  ;;  %v2485_v17 = vld [vmem:[%s3651_s15 + $0xb8] sm:$0xff] }
0x1265   :  { %2753 = vmatprep.subr.mxu0 %v1642_v19 }
0x1266   :  { %2754 = vmatpush3.msra.mxu0 %v1642_v19  ;;  %v2484_v19 = vld [vmem:[%s3651_s15 + $0xb0] sm:$0xff] }
0x1267   :  { %2765 = vmatprep.subr.mxu0 %v2443_v20 }
0x1268   :  { %v2889_v21 = vpop.eup %2888 }
0x1269   :  { %v1640_v24 = vmul.f32 %v2889_v21, %v2885_v15  ;;  %v2491_v15 = vld [vmem:[%s3651_s15 + $0xe8] sm:$0xff]  ;;  %v2482_v21 = vld [vmem:[%s3651_s15 + $0xa0] sm:$0xff] }
0x126c   :  { %v2891_v23 = vpop.eup %2890 }
0x126d   :  { %v1638_v22 = vmul.f32 %v2891_v23, %v2887_v9  ;;  %v2489_v9 = vld [vmem:[%s3651_s15 + $0xd8] sm:$0xff] }
0x126e   :  { %v2481_v23 = vld [vmem:[%s3651_s15 + $0x98] sm:$0xff] }
0x126f   :  { %2755 = vmatprep.mubr.msk.f32.mxu0 %vm431_vm6, %v1638_v22  ;;  %v2480_v22 = vld [vmem:[%s3651_s15 + $0x90] sm:$0xff] }
0x1270   :  { %2756 = vmatmul.mubr.msk.f32.vlgmr.msra.gmra.mxu0 %vm431_vm6, %v1640_v24  ;;  %v2479_v24 = vld [vmem:[%s3651_s15 + $0x88] sm:$0xff] }
0x1271   :  { %2766 = vmatpush3.msra.mxu0 %v2443_v20  ;;  %2769 = vmatprep.mubr.msk.f32.mxu0 %vm343_vm4, %v1515_v60  ;;  %v2483_v20 = vld [vmem:[%s3651_s15 + $0xa8] sm:$0xff] }
0x1272   :  { %2767 = vmatprep.subr.mxu0 %v2442_v25 }
0x1273   :  { %2768 = vmatpush3.msra.mxu0 %v2442_v25  ;;  %v2478_v25 = vld [vmem:[%s3651_s15 + $0x80] sm:$0xff] }
0x1274   :  { %2770 = vmatmul.mubr.msk.f32.vlgmr.msra.gmra.mxu0 %vm343_vm4, %v2743_v59  ;;  %2783 = vmatprep.subr.mxu0 %v2493_v11 }
0x1275   :  { %2784 = vmatpush3.msra.mxu0 %v2493_v11 }
0x1276   :  { %2785 = vmatprep.subr.mxu0 %v2492_v12 }
0x1277   :  { %2786 = vmatpush3.msra.mxu0 %v2492_v12 }
0x1278   :  { %2787 = vmatprep.subr.mxu0 %v2491_v15 }
0x1279   :  { %2788 = vmatpush3.msra.mxu0 %v2491_v15 }
0x127a   :  { %2789 = vmatprep.subr.mxu0 %v2490_v13 }
0x127b   :  { %2790 = vmatpush3.msra.mxu0 %v2490_v13 }
0x127c   :  { %2791 = vmatprep.subr.mxu0 %v2489_v9 }
0x127d   :  { %2792 = vmatpush3.msra.mxu0 %v2489_v9 }
0x127e   :  { %2793 = vmatprep.subr.mxu0 %v2488_v18 }
0x127f   :  { %2794 = vmatpush3.msra.mxu0 %v2488_v18 }
0x1280   :  { %2795 = vmatprep.subr.mxu0 %v2487_v14 }
0x1281   :  { %2796 = vmatpush3.msra.mxu0 %v2487_v14 }
0x1282   :  { %2797 = vmatprep.subr.mxu0 %v2486_v16 }
0x1283   :  { %2798 = vmatpush3.msra.mxu0 %v2486_v16  ;;  %v2301_v16 = vld [vmem:[%s3657_s21 + $0x18] sm:$0xff] }
0x1284   :  { %2799 = vmatprep.subr.mxu0 %v2485_v17 }
0x1285   :  { %2800 = vmatpush3.msra.mxu0 %v2485_v17  ;;  %v2300_v17 = vld [vmem:[%s3657_s21 + $0x10] sm:$0xff] }
0x1286   :  { %2801 = vmatprep.subr.mxu0 %v2484_v19 }
0x1287   :  { %2802 = vmatpush3.msra.mxu0 %v2484_v19  ;;  %v2299_v19 = vld [vmem:[%s3657_s21 + $0x8] sm:$0xff] }
0x1288   :  { %2803 = vmatprep.subr.mxu0 %v2483_v20 }
0x1289   :  { %2804 = vmatpush3.msra.mxu0 %v2483_v20  ;;  %v2298_v20 = vld [vmem:[%s3657_s21] sm:$0xff] }
0x128a   :  { %2805 = vmatprep.subr.mxu0 %v2482_v21 }
0x128b   :  { %2806 = vmatpush3.msra.mxu0 %v2482_v21 }
0x128c   :  { %2807 = vmatprep.subr.mxu0 %v2481_v23 }
0x128d   :  { %2808 = vmatpush3.msra.mxu0 %v2481_v23 }
0x128e   :  { %2809 = vmatprep.subr.mxu0 %v2480_v22 }
0x128f   :  { %2810 = vmatpush3.msra.mxu0 %v2480_v22 }
0x1290   :  { %2811 = vmatprep.subr.mxu0 %v2479_v24 }
0x1291   :  { %2812 = vmatpush3.msra.mxu0 %v2479_v24 }
0x1292   :  { %2813 = vmatprep.subr.mxu0 %v2478_v25 }
0x1293   :  { %2814 = vmatpush3.msra.mxu0 %v2478_v25  ;;  %v2500_v25 = vld [vmem:[%s3655_s19] ss:$0 sm:$0xff]  ;;  %s2904_s19 = scalar_lea.vmem %s2390_s10, 32 }
0x1294   :  { %p2905_p0 = scmp.ne.s32.totalorder %s2390_s10, %s2904_s19  ;;  %p2910_p2 = scmp.lt.s32.totalorder %s2904_s19, %s2904_s19 }
0x1296   :  { %p2911_p3 = por %p2910_p2, %p2909_p1 }
0x1298   :  { %p2912_p4 = pnand %p2911_p3, %p2905_p0 }
0x1330   :  { %v2757_v28 = vpop.f32.mrf.mxu0 }
0x1332   :  { %v1720_v30 = vpop.f32.mrf.mxu0 }
0x1333   :  { %2762 = vmatprep.mubr.msk.f32.mxu1 %vm343_vm4, %v1720_v30 }
0x1334   :  { %2763 = vmatmul.mubr.msk.f32.vlgmr.msra.gmra.mxu1 %vm343_vm4, %v2757_v28  ;;  %v2771_v33 = vpop.f32.mrf.mxu0 }
0x1335   :  { %2773 = vmatpush3.msra.mxu1 %v2473_v55 }
0x1336   :  { %v1882_v36 = vpop.f32.mrf.mxu0  ;;  %2774 = vmatprep.subr.mxu1 %v2472_v56 }
0x1337   :  { %2775 = vmatpush3.msra.mxu1 %v2472_v56 }
0x1338   :  { %2776 = vmatprep.subr.mxu1 %v2471_v57 }
0x1339   :  { %2777 = vmatpush3.msra.mxu1 %v2471_v57 }
0x133a   :  { %2778 = vmatprep.subr.mxu1 %v2470_v29 }
0x133b   :  { %2779 = vmatpush3.msra.mxu1 %v2470_v29 }
0x133c   :  { %2818 = vmatprep.subr.mxu1 %v2926_v1 }
0x13f4   :  { %v2764_v34 = vpop.f32.mrf.mxu1 }
0x13f5   :  { %v1888_v35 = vadd.f32 %v2771_v33, %v2764_v34 }
0x13f6   :  { %v1801_v37 = vpop.f32.mrf.mxu1 }
0x13f7   :  { %v1892_v39 = vadd.f32 %v1888_v35, %v3385_v48  ;;  %v1883_v40 = vadd.f32 %v1882_v36, %v1801_v37 }
0x13f9   :  { %v3499_v41 = vadd.f32 %v2465_v38, %v1892_v39  ;;  %v1891_v32 = vadd.f32 %v1883_v40, %v3388_v50 }
0x13fb   :  { %v3502_v42 = vadd.f32 %v2465_v38, %v1891_v32  ;;  %v1910_v43 = vsel %vm200_vm3, %v3499_v41, 0.0 }
0x13fc   :  { %1911 = vadd.xlane.f32.xlu0 %v1910_v43 }
0x13fd   :  { %v1907_v44 = vsel %vm196_vm2, %v3502_v42, 0.0 }
0x13fe   :  { %1908 = vadd.xlane.f32.xlu1 %v1907_v44 }
0x1485   :  { %v1912_v45 = vpop.xlane.xlu0 %1911 }
0x1486   :  { %v1914_v46 = vmul.f32 0.03125, %v1912_v45 }
0x1487   :  { %v1909_v47 = vpop.xlane.xlu1 %1908 }
0x1488   :  { %v1916_v48 = vsub.f32 %v3499_v41, %v1914_v46  ;;  %v1913_v49 = vmul.f32 0.03125, %v1909_v47 }
0x148a   :  { %v1915_v51 = vsub.f32 %v3502_v42, %v1913_v49  ;;  %v1918_v52 = vmul.f32 %v1916_v48, %v1916_v48 }
0x148c   :  { %v1922_v50 = vsel %vm200_vm3, %v1918_v52, 0.0  ;;  %v1917_v53 = vmul.f32 %v1915_v51, %v1915_v51 }
0x148d   :  { %1923 = vadd.xlane.f32.xlu1 %v1922_v50 }
0x148e   :  { %v1919_v54 = vsel %vm196_vm2, %v1917_v53, 0.0  ;;  %v2495_v53 = vld [vmem:[%s3652_s16 + $0x1] ss:$0 sm:$0xff] }
0x148f   :  { %1920 = vadd.xlane.f32.xlu0 %v1919_v54 }
0x1516   :  { %v1924_v58 = vpop.xlane.xlu1 %1923 }
0x1517   :  { %v1926_v31 = vmul.f32 0.03125, %v1924_v58 }
0x1518   :  { %v1921_v59 = vpop.xlane.xlu0 %1920 }
0x1519   :  { %v1928_v60 = vadd.f32 1e-06, %v1926_v31  ;;  %v1925_v61 = vmul.f32 0.03125, %v1921_v59  ;;  %v2163_v31 = vld [vmem:[%s3685_s1] sm:$0x3] }
0x151b   :  { %2892 = vrsqrt.f32 %v1928_v60  ;;  %v1927_v62 = vadd.f32 1e-06, %v1925_v61 }
0x151d   :  { %2894 = vrsqrt.f32 %v1927_v62 }
0x1528   :  { %v2893_v63 = vpop.eup %2892 }
0x1529   :  { %v1932_v2 = vmul.f32 %v2893_v63, %v1916_v48 }
0x152a   :  { %v2895_v3 = vpop.eup %2894 }
0x152b   :  { %v1931_v4 = vmul.f32 %v2895_v3, %v1915_v51  ;;  %v1940_v5 = vmul.f32 %v2468_v0, %v1932_v2 }
0x152d   :  { %v1939_v7 = vmul.f32 %v2468_v0, %v1931_v4  ;;  %v1948_v10 = vadd.f32 %v2469_v6, %v1940_v5 }
0x152f   :  { %v1947_v8 = vadd.f32 %v2469_v6, %v1939_v7  ;;  %v2498_v6 = vld [vmem:[%s3653_s17] ss:$0 sm:$0xff] }
0x1531   :  { %2780 = vmatprep.mubr.msk.f32.mxu1 %vm196_vm2, %v1947_v8  ;;  %v2499_v8 = vld [vmem:[%s3654_s18] ss:$0 sm:$0xff] }
0x1532   :  { %2781 = vmatmul.mubr.msk.f32.vlgmr.msra.gmra.mxu1 %vm196_vm2, %v1948_v10 }
0x1533   :  { %2822 = vmatprep.mubr.msk.f32.mxu1 %vm2932_vm8, %v2926_v1 }
0x15f2   :  { %v2782_v27 = vpop.f32.mrf.mxu1 }
0x15f3   :  { %v2040_v28 = vadd.f32 %v2782_v27, %v2475_v26  ;;  %v2501_v27 = vld [vmem:[%s3656_s20] ss:$0 sm:$0xff] }
0x15f4   :  { %v2034_v30 = vpop.f32.mrf.mxu1 }
0x15f5   :  { %v2046_v33 = vmul.f32 0.044715, %v2040_v28  ;;  %v2035_v34 = vadd.f32 %v2475_v26, %v2034_v30  ;;  %v2044_v51 = vmul.f32 0.5, %v2040_v28 }
0x15f7   :  { %v2048_v35 = vmul.f32 %v2046_v33, %v2040_v28  ;;  %v2045_v36 = vmul.f32 0.044715, %v2035_v34  ;;  %v2043_v48 = vmul.f32 0.5, %v2035_v34 }
0x15f9   :  { %v2050_v38 = vmul.f32 %v2048_v35, %v2040_v28  ;;  %v2047_v37 = vmul.f32 %v2045_v36, %v2035_v34 }
0x15fb   :  { %v2052_v39 = vadd.f32 %v2050_v38, %v2040_v28  ;;  %v2049_v40 = vmul.f32 %v2047_v37, %v2035_v34 }
0x15fd   :  { %v2051_v32 = vadd.f32 %v2049_v40, %v2035_v34  ;;  %v2054_v43 = vmul.f32 0.7978846, %v2052_v39 }
0x15ff   :  { %v2053_v44 = vmul.f32 0.7978846, %v2051_v32  ;;  %2896 = vtanh.f32 %v2054_v43 }
0x1601   :  { %2898 = vtanh.f32 %v2053_v44 }
0x160c   :  { %v2897_v45 = vpop.eup %2896 }
0x160d   :  { %v2058_v47 = vadd.f32 1.0, %v2897_v45 }
0x160e   :  { %v2899_v46 = vpop.eup %2898 }
0x160f   :  { %v2057_v49 = vadd.f32 1.0, %v2899_v46  ;;  %v2060_v50 = vmul.f32 %v2058_v47, %v2044_v51 }
0x1611   :  { %v2059_v52 = vmul.f32 %v2057_v49, %v2043_v48 }
0x1613   :  { %2815 = vmatprep.mubr.f32.mxu0 %v2059_v52 }
0x1614   :  { %2816 = vmatmul.mubr.f32.vlgmr.msra.gmra.mxu0 %v2060_v50 }
0x16d4   :  { %v2817_v54 = vpop.f32.mrf.mxu0 }
0x16d5   :  { %v2158_v55 = vadd.f32 %v2817_v54, %v2495_v53 }
0x16d6   :  { %v2152_v56 = vpop.f32.mrf.mxu0 }
0x16d7   :  { %v2162_v57 = vadd.f32 %v2158_v55, %v3499_v41  ;;  %v2153_v29 = vadd.f32 %v2495_v53, %v2152_v56 }
0x16d9   :  { %v2161_v58 = vadd.f32 %v2153_v29, %v3502_v42  ;;  %2819 = vmatpush3.msk.msra.mxu1 %vm466_vm7, %v2162_v57 }
0x16da   :  { %2820 = vmatprep.subr.mxu1 %v2926_v1 }
0x16db   :  { %2821 = vmatpush3.msra.mxu1 %v2161_v58 }
0x16dc   :  { %2823 = vmatmul.mubr.msk.f32.vlgmr.msra.gmra.mxu1 %vm431_vm6, %v2163_v31  ;;  %2825 = vmatprep.subr.mxu1 %v2926_v1 }
0x16dd   :  { %2833 = vmatprep.mubr.msk.f32.mxu1 %vm2932_vm8, %v2926_v1  ;;  %2826 = vmatpush3.msra.mxu1 %v2301_v16 }
0x16de   :  { %2827 = vmatprep.subr.mxu1 %v2926_v1 }
0x16df   :  { %2828 = vmatpush3.msra.mxu1 %v2300_v17 }
0x16e0   :  { %2829 = vmatprep.subr.mxu1 %v2926_v1 }
0x16e1   :  { %2830 = vmatpush3.msra.mxu1 %v2299_v19 }
0x16e2   :  { %2831 = vmatprep.subr.mxu1 %v2926_v1  ;;  %v2502_v1 = vld [vmem:[%s3658_s22] ss:$0 sm:$0xff] }
0x16e3   :  { %2832 = vmatpush3.msra.mxu1 %v2298_v20 }
0x179c   :  { %v2236_v59 = vpop.f32.mrf.mxu1 }
0x179d   :  { %v2242_v41 = vsel %vm200_vm3, %v2236_v59, 0.0 }
0x179e   :  { %2243 = vadd.xlane.f32.xlu0 %v2242_v41  ;;  %v2824_v42 = vpop.f32.mrf.mxu1 }
0x1827   :  { %v2244_v60 = vpop.xlane.xlu0 %2243 }
0x1828   :  { %v2245_v61 = vmul.f32 0.03125, %v2244_v60 }
0x182a   :  { %v2246_v62 = vsub.f32 %v2236_v59, %v2245_v61 }
0x182c   :  { %v2247_v63 = vmul.f32 %v2246_v62, %v2246_v62 }
0x182e   :  { %v2248_v0 = vsel %vm200_vm3, %v2247_v63, 0.0 }
0x182f   :  { %2249 = vadd.xlane.f32.xlu1 %v2248_v0 }
0x18b8   :  { %v2250_v2 = vpop.xlane.xlu1 %2249 }
0x18b9   :  { %v2251_v3 = vmul.f32 0.03125, %v2250_v2 }
0x18bb   :  { %v2252_v4 = vadd.f32 1e-06, %v2251_v3 }
0x18bd   :  { %2900 = vrsqrt.f32 %v2252_v4 }
0x18ca   :  { %v2901_v5 = vpop.eup %2900 }
0x18cb   :  { %v2254_v7 = vmul.f32 %v2901_v5, %v2246_v62 }
0x18cd   :  { %v2261_v10 = vmul.f32 %v2498_v6, %v2254_v7 }
0x18cf   :  { %v2268_v11 = vadd.f32 %v2499_v8, %v2261_v10 }
0x18d1   :  { %v2271_v12 = vsel %vm200_vm3, %v2268_v11, 0.0 }
0x18d2   :  { %2272 = vadd.xlane.f32.xlu0 %v2271_v12 }
0x195b   :  { %v2273_v15 = vpop.xlane.xlu0 %2272 }
0x195c   :  { %v2274_v13 = vmul.f32 0.03125, %v2273_v15 }
0x195e   :  { %v2275_v9 = vsub.f32 %v2268_v11, %v2274_v13 }
0x1960   :  { %v2276_v18 = vmul.f32 %v2275_v9, %v2275_v9 }
0x1962   :  { %v2277_v14 = vsel %vm200_vm3, %v2276_v18, 0.0 }
0x1963   :  { %2278 = vadd.xlane.f32.xlu1 %v2277_v14 }
0x19ec   :  { %v2279_v21 = vpop.xlane.xlu1 %2278 }
0x19ed   :  { %v2280_v23 = vmul.f32 0.03125, %v2279_v21 }
0x19ef   :  { %v2281_v22 = vadd.f32 1e-06, %v2280_v23 }
0x19f1   :  { %2902 = vrsqrt.f32 %v2281_v22 }
0x19fe   :  { %v2903_v24 = vpop.eup %2902 }
0x19ff   :  { %v2283_v26 = vmul.f32 %v2903_v24, %v2275_v9 }
0x1a01   :  { %v2290_v28 = vmul.f32 %v2500_v25, %v2283_v26 }
0x1a03   :  { %v2297_v30 = vadd.f32 %v2501_v27, %v2290_v28 }
0x1a05   :  { %2834 = vmatmul.mubr.msk.f32.vlgmr.msra.gmra.mxu1 %vm196_vm2, %v2297_v30 }
0x1ac5   :  { %v2378_v33 = vpop.f32.mrf.mxu1 }
0x1ac6   :  { %v2379_v34 = vadd.f32 %v2502_v1, %v2378_v33 }
0x1ac7   :  { %v2835_v35 = vpop.f32.mrf.mxu1 }
0x1ac8   :  { %2382 = vst [vmem:[#allocation2] sm:$0x3] %v2379_v34 }
0x1ac9   :  { %2915 = shalt.err (!%p2912_p4)
}
0x1aca   :  { %2392 = dma.vmem_to_hbm [thread:$0]  %s2390_s10, 32, %s3659_s23, [#allocation3]  }
0x1acb   :  { %2924 = dma.done.wait [#allocation3], 32  }
0x1acc   :  { %2925 = vsyncadd [#allocation3], 4294967264 }
0x1acd   :  { %2396 = vsyncpa [#allocation3], 1 }

</bundles_post_ra>
